<compile_context>
chip_gen: v7x
topology: tpu7x:2x2x1
jax: 0.10.0
libtpu: 0.0.40
codegen_flags: <defaults>
</compile_context>

<pallas_src>
import functools

import jax
import jax.numpy as jnp
from jax.experimental import pallas as pl
from jax.experimental.pallas import tpu as pltpu


# ------------------------------ fused Pallas kernel ------------------------------

def byol_fused_kernel(patches_ref, cw_ref, w1cat_ref, mat_ref, vec_ref, out_ref,
                      *, B, HW, FEAT, HID, PROJ):
    # ---- unpack the packed vector slab (one lane-dense DMA for all small params)
    vecs = vec_ref[...]                               # (16, VLANES) f32
    conv_b  = vecs[0:1, :FEAT]                        # (1, FEAT)
    proj_b1 = vecs[1:2, :2 * HID]
    proj_g  = vecs[2:3, :2 * HID]
    proj_be = vecs[3:4, :2 * HID]
    proj_b2 = vecs[4:5, :2 * PROJ]
    pred_b1 = vecs[5:6, :HID]
    pred_g  = vecs[6:7, :HID]
    pred_be = vecs[7:8, :HID]
    pred_b2 = vecs[8:9, :2 * PROJ]
    pool    = vecs[9:9 + B, :B * HW]                  # (B, B*HW) 1/HW block diagonal

    # ---- matrix slab slices (static ref slices, no extra DMAs)
    proj_w2 = mat_ref[0:2 * HID, 0:2 * PROJ]                              # block-diag
    pred_w1 = mat_ref[2 * HID:2 * HID + 2 * PROJ, 0:HID]                  # rows PROJ: zero
    pred_w2 = mat_ref[2 * HID + 2 * PROJ:2 * HID + 2 * PROJ + HID, 0:2 * PROJ]  # cols PROJ: zero

    # ---- backbone: conv3x3 as im2col matmul (bf16 MXU operands, f32 accumulate)
    h = jnp.dot(patches_ref[...], cw_ref[...], preferred_element_type=jnp.float32)
    h = jnp.maximum(h + conv_b, 0.0)                  # (B*HW, FEAT)

    # AdaptiveAvgPool2d(1) as an MXU pooling matmul with the precomputed pool matrix.
    rep = jnp.dot(pool, h, preferred_element_type=jnp.float32)            # (B, FEAT)

    # ---- Linear -> BatchNorm1d (train-mode batch stats, eps=1e-5) -> ReLU helper
    def bn_relu(hh, g, be):
        mean = jnp.mean(hh, axis=0, keepdims=True)
        var = jnp.mean((hh - mean) ** 2, axis=0, keepdims=True)           # biased var (PyTorch fwd)
        hh = (hh - mean) * jax.lax.rsqrt(var + 1e-5)
        return jnp.maximum(hh * g + be, 0.0)

    # ---- fused online-projection + target-projection MLPs (shared input rep)
    ph = jnp.dot(rep.astype(w1cat_ref.dtype), w1cat_ref[...],
                 preferred_element_type=jnp.float32) + proj_b1            # (B, 2*HID)
    ph = bn_relu(ph, proj_g, proj_be)
    proj_out = jnp.dot(ph, proj_w2, preferred_element_type=jnp.float32) + proj_b2
    # proj_out: cols [0:PROJ] = online projection, cols [PROJ:2*PROJ] = target projection

    # ---- online prediction MLP (input = online projection; pred_w1 rows PROJ: are zero,
    #      so feeding the full proj_out is exactly online_proj @ w1)
    qh = jnp.dot(proj_out, pred_w1, preferred_element_type=jnp.float32) + pred_b1
    qh = bn_relu(qh, pred_g, pred_be)
    pred_out = jnp.dot(qh, pred_w2, preferred_element_type=jnp.float32) + pred_b2
    # pred_out: cols [0:PROJ] = online prediction, cols [PROJ:] = 0

    # ---- BYOL loss: 2 - 2*cos_sim, symmetric branches folded (views identical).
    def l2n(v):  # F.normalize parity: v / max(||v||, 1e-12) == v * rsqrt(max(||v||^2, 1e-24))
        ss = jnp.sum(v * v, axis=-1, keepdims=True)
        return v * jax.lax.rsqrt(jnp.maximum(ss, 1e-24))

    p = l2n(pred_out[:, :PROJ])
    t = l2n(proj_out[:, PROJ:2 * PROJ])
    loss_one = 2.0 - 2.0 * jnp.sum(p * t, axis=-1, keepdims=True)         # (B, 1)
    loss = 2.0 * jnp.mean(loss_one)
    out_ref[...] = jnp.broadcast_to(jnp.reshape(loss, (1, 1)), (1, 128)).astype(jnp.float32)


# ------------------------------ JAX wrapper ---------------------------------------

def byol_forward(x, conv_w, conv_b, online_proj, online_pred, target_proj):
    # TODO(synk): torchvision augmentations (ColorJitter/RandomGrayscale/Flip/ResizedCrop)
    # are stochastic host-side ops with no Pallas equivalent; applied as identity here.
    B, C, H, W = x.shape
    k, pad = 3, 1
    FEAT = conv_w.shape[0]
    K = C * k * k
    KPAD = 128                                         # lane-dense contraction dim
    HW = H * W
    BHW = B * HW
    HID = online_proj[0].shape[1]
    PROJ = online_proj[4].shape[1]

    # im2col kept as host-side XLA layout glue (channels-last C=3 tiles would force
    # VMEM relayout copies in-kernel); the conv itself runs in-kernel as one matmul.
    xp = jnp.pad(x, ((0, 0), (0, 0), (pad, pad), (pad, pad)))
    cols = jnp.stack([xp[:, :, i:i + H, j:j + W] for i in range(k) for j in range(k)],
                     axis=2)                            # (B, C, 9, H, W)
    patches = cols.transpose(0, 3, 4, 1, 2).reshape(BHW, K)
    patches = jnp.pad(patches, ((0, 0), (0, KPAD - K))).astype(jnp.bfloat16)  # (BHW,128)

    cw = jnp.pad(conv_w.reshape(FEAT, K).T,
                 ((0, KPAD - K), (0, 0))).astype(jnp.bfloat16)                # (128, FEAT)

    opj_w1, opj_b1, opj_g, opj_be, opj_w2, opj_b2 = online_proj
    opr_w1, opr_b1, opr_g, opr_be, opr_w2, opr_b2 = online_pred
    tpj_w1, tpj_b1, tpj_g, tpj_be, tpj_w2, tpj_b2 = target_proj

    # fused online/target projection first layer (bf16 MXU operand, 256-wide N)
    w1cat = jnp.concatenate([opj_w1, tpj_w1], axis=1).astype(jnp.bfloat16)    # (FEAT, 2*HID)

    # matrix slab: block-diag proj w2 | zero-row-padded pred w1 | zero-col-padded pred w2
    MW = max(HID, 2 * PROJ)
    mat = jnp.zeros((2 * HID + 2 * PROJ + HID, MW), jnp.float32)
    mat = mat.at[:HID, :PROJ].set(opj_w2)
    mat = mat.at[HID:2 * HID, PROJ:2 * PROJ].set(tpj_w2)
    mat = mat.at[2 * HID:2 * HID + PROJ, :HID].set(opr_w1)
    mat = mat.at[2 * HID + 2 * PROJ:2 * HID + 2 * PROJ + HID, :PROJ].set(opr_w2)

    # vector slab: all biases / BN params / pooling matrix in one lane-dense array
    VLANES = ((max(FEAT, 2 * HID, 2 * PROJ, BHW) + 127) // 128) * 128
    VROWS = ((9 + B + 7) // 8) * 8
    vec = jnp.zeros((VROWS, VLANES), jnp.float32)
    vec = vec.at[0, :FEAT].set(conv_b)
    vec = vec.at[1, :2 * HID].set(jnp.concatenate([opj_b1[0], tpj_b1[0]]))
    vec = vec.at[2, :2 * HID].set(jnp.concatenate([opj_g[0], tpj_g[0]]))
    vec = vec.at[3, :2 * HID].set(jnp.concatenate([opj_be[0], tpj_be[0]]))
    vec = vec.at[4, :2 * PROJ].set(jnp.concatenate([opj_b2[0], tpj_b2[0]]))
    vec = vec.at[5, :HID].set(opr_b1[0])
    vec = vec.at[6, :HID].set(opr_g[0])
    vec = vec.at[7, :HID].set(opr_be[0])
    vec = vec.at[8, :PROJ].set(opr_b2[0])
    pool = jnp.repeat(jnp.eye(B, dtype=jnp.float32), HW, axis=1) / HW         # (B, BHW)
    vec = vec.at[9:9 + B, :BHW].set(pool)

    flops = 2 * (BHW * KPAD * FEAT            # conv matmul
                 + B * BHW * FEAT             # pooling matmul
                 + B * (FEAT * 2 * HID + 2 * HID * 2 * PROJ)   # fused projections
                 + B * (2 * PROJ * HID + HID * 2 * PROJ))      # prediction
    operands = (patches, cw, w1cat, mat, vec)
    bytes_accessed = sum(int(a.size) * a.dtype.itemsize for a in operands) + 128 * 4

    kern = functools.partial(byol_fused_kernel, B=B, HW=HW, FEAT=FEAT, HID=HID, PROJ=PROJ)
    out = pl.pallas_call(
        kern,
        out_shape=jax.ShapeDtypeStruct((1, 128), jnp.float32),
        compiler_params=pltpu.CompilerParams(vmem_limit_bytes=8 * 1024 * 1024),
        cost_estimate=pl.CostEstimate(flops=int(flops),
                                      transcendentals=int(3 * HID + 2 * B),
                                      bytes_accessed=int(bytes_accessed)),
    )(*operands)
    return out[0, 0]


# --------------------------------- main --------------------------------------------

if __name__ == "__main__":
    B, C, H, W = 2, 3, 8, 8        # small synthetic image batch
    REP = 512                      # hardcoded in Online/Target: MLP(512, ...)
    HID = 128                      # projection_hidden_size (scaled down from 4096)
    PROJ = 64                      # projection_size (scaled down from 256)

    key = jax.random.PRNGKey(0)
    ks = jax.random.split(key, 8)

    # backbone conv (the `net` passed to BYOL, minus its head): Conv3x3 -> ReLU -> GAP
    conv_w = jax.random.normal(ks[0], (REP, C, 3, 3), jnp.float32) * (1.0 / (C * 9) ** 0.5)
    conv_b = jax.random.normal(ks[1], (REP,), jnp.float32) * 0.01

    def mlp_params(k, din, dh, dout):
        k1, k2, k3, k4 = jax.random.split(k, 4)
        w1 = jax.random.normal(k1, (din, dh), jnp.float32) / (din ** 0.5)
        b1 = jax.random.normal(k2, (1, dh), jnp.float32) * 0.01
        g = jnp.ones((1, dh), jnp.float32)    # BatchNorm1d weight init
        be = jnp.zeros((1, dh), jnp.float32)  # BatchNorm1d bias init
        w2 = jax.random.normal(k3, (dh, dout), jnp.float32) / (dh ** 0.5)
        b2 = jax.random.normal(k4, (1, dout), jnp.float32) * 0.01
        return (w1, b1, g, be, w2, b2)

    online_proj = mlp_params(ks[2], REP, HID, PROJ)   # Online.projection
    online_pred = mlp_params(ks[3], PROJ, HID, PROJ)  # Online.prediction
    target_proj = mlp_params(ks[4], REP, HID, PROJ)   # Target.projection (independent init)

    x = jax.random.normal(ks[5], (B, C, H, W), jnp.float32)

    fwd = jax.jit(byol_forward)
    loss = fwd(x, conv_w, conv_b, online_proj, online_pred, target_proj)
    loss = jax.block_until_ready(loss)
    assert loss.shape == () and jnp.isfinite(loss)
    print("KERNEL_OK")
</pallas_src>

<mosaic_0001>
module attributes {stable_mosaic.version = 11 : i64} {
  func.func @byol_fused_kernel(%arg0: memref<128x128xbf16, #tpu.memory_space<vmem>>, %arg1: memref<128x512xbf16, #tpu.memory_space<vmem>>, %arg2: memref<512x256xbf16, #tpu.memory_space<vmem>>, %arg3: memref<512x128xf32, #tpu.memory_space<vmem>>, %arg4: memref<16x512xf32, #tpu.memory_space<vmem>>, %arg5: memref<1x128xf32, #tpu.memory_space<vmem>>) attributes {dimension_semantics = [], scalar_prefetch = 0 : i64, scratch_operands = 0 : i64, tpu.core_type = #tpu.core_type<tc>} {
    %c0 = arith.constant 0 : index
    %c0_0 = arith.constant 0 : index
    %0 = vector.load %arg4[%c0, %c0_0] : memref<16x512xf32, #tpu.memory_space<vmem>>, vector<16x512xf32>
    %1 = vector.extract_strided_slice %0 {offsets = [0, 0], sizes = [1, 512], strides = [1, 1]} : vector<16x512xf32> to vector<1x512xf32>
    %2 = vector.extract_strided_slice %0 {offsets = [1, 0], sizes = [1, 256], strides = [1, 1]} : vector<16x512xf32> to vector<1x256xf32>
    %3 = vector.extract_strided_slice %0 {offsets = [2, 0], sizes = [1, 256], strides = [1, 1]} : vector<16x512xf32> to vector<1x256xf32>
    %4 = vector.extract_strided_slice %0 {offsets = [3, 0], sizes = [1, 256], strides = [1, 1]} : vector<16x512xf32> to vector<1x256xf32>
    %5 = vector.extract_strided_slice %0 {offsets = [4, 0], sizes = [1, 128], strides = [1, 1]} : vector<16x512xf32> to vector<1x128xf32>
    %6 = vector.extract_strided_slice %0 {offsets = [5, 0], sizes = [1, 128], strides = [1, 1]} : vector<16x512xf32> to vector<1x128xf32>
    %7 = vector.extract_strided_slice %0 {offsets = [6, 0], sizes = [1, 128], strides = [1, 1]} : vector<16x512xf32> to vector<1x128xf32>
    %8 = vector.extract_strided_slice %0 {offsets = [7, 0], sizes = [1, 128], strides = [1, 1]} : vector<16x512xf32> to vector<1x128xf32>
    %9 = vector.extract_strided_slice %0 {offsets = [8, 0], sizes = [1, 128], strides = [1, 1]} : vector<16x512xf32> to vector<1x128xf32>
    %10 = vector.extract_strided_slice %0 {offsets = [9, 0], sizes = [2, 128], strides = [1, 1]} : vector<16x512xf32> to vector<2x128xf32>
    %c0_1 = arith.constant 0 : index
    %c0_2 = arith.constant 0 : index
    %11 = vector.load %arg3[%c0_1, %c0_2] : memref<512x128xf32, #tpu.memory_space<vmem>>, vector<256x128xf32>
    %c256 = arith.constant 256 : index
    %c0_3 = arith.constant 0 : index
    %12 = vector.load %arg3[%c256, %c0_3] : memref<512x128xf32, #tpu.memory_space<vmem>>, vector<128x128xf32>
    %c384 = arith.constant 384 : index
    %c0_4 = arith.constant 0 : index
    %13 = vector.load %arg3[%c384, %c0_4] : memref<512x128xf32, #tpu.memory_space<vmem>>, vector<128x128xf32>
    %c0_5 = arith.constant 0 : index
    %c0_6 = arith.constant 0 : index
    %14 = vector.load %arg0[%c0_5, %c0_6] : memref<128x128xbf16, #tpu.memory_space<vmem>>, vector<128x128xbf16>
    %c0_7 = arith.constant 0 : index
    %c0_8 = arith.constant 0 : index
    %15 = vector.load %arg1[%c0_7, %c0_8] : memref<128x512xbf16, #tpu.memory_space<vmem>>, vector<128x512xbf16>
    %cst = arith.constant dense<0.000000e+00> : vector<128x512xf32>
    %16 = tpu.matmul %14, %15, %cst {dimension_numbers = #tpu.dot_dimension_numbers<[1], [0], [0], [1], [0, 0, 1, 1], [], []>} : vector<128x128xbf16>, vector<128x512xbf16>, vector<128x512xf32> -> vector<128x512xf32>
    %17 = vector.broadcast %1 : vector<1x512xf32> to vector<128x512xf32>
    %18 = arith.addf %16, %17 : vector<128x512xf32>
    %cst_9 = arith.constant 0.000000e+00 : f32
    %19 = vector.broadcast %cst_9 : f32 to vector<128x512xf32>
    %20 = arith.maximumf %18, %19 : vector<128x512xf32>
    %cst_10 = arith.constant dense<0.000000e+00> : vector<2x512xf32>
    %21 = tpu.matmul %10, %20, %cst_10 {dimension_numbers = #tpu.dot_dimension_numbers<[1], [0], [0], [1], [0, 0, 1, 1], [], []>} : vector<2x128xf32>, vector<128x512xf32>, vector<2x512xf32> -> vector<2x512xf32>
    %22 = arith.truncf %21 : vector<2x512xf32> to vector<2x512xbf16>
    %c0_11 = arith.constant 0 : index
    %c0_12 = arith.constant 0 : index
    %23 = vector.load %arg2[%c0_11, %c0_12] : memref<512x256xbf16, #tpu.memory_space<vmem>>, vector<512x256xbf16>
    %cst_13 = arith.constant dense<0.000000e+00> : vector<2x256xf32>
    %24 = tpu.matmul %22, %23, %cst_13 {dimension_numbers = #tpu.dot_dimension_numbers<[1], [0], [0], [1], [0, 0, 1, 1], [], []>} : vector<2x512xbf16>, vector<512x256xbf16>, vector<2x256xf32> -> vector<2x256xf32>
    %25 = vector.broadcast %2 : vector<1x256xf32> to vector<2x256xf32>
    %26 = arith.addf %24, %25 : vector<2x256xf32>
    %cst_14 = arith.constant dense<0.000000e+00> : vector<256xf32>
    %27 = vector.multi_reduction <add>, %26, %cst_14 [0] : vector<2x256xf32> to vector<256xf32>
    %28 = vector.shape_cast %27 : vector<256xf32> to vector<1x256xf32>
    %cst_15 = arith.constant 2.000000e+00 : f32
    %29 = vector.broadcast %cst_15 : f32 to vector<1x256xf32>
    %30 = arith.divf %28, %29 : vector<1x256xf32>
    %31 = vector.broadcast %30 : vector<1x256xf32> to vector<2x256xf32>
    %32 = arith.subf %26, %31 : vector<2x256xf32>
    %33 = arith.mulf %32, %32 : vector<2x256xf32>
    %cst_16 = arith.constant dense<0.000000e+00> : vector<256xf32>
    %34 = vector.multi_reduction <add>, %33, %cst_16 [0] : vector<2x256xf32> to vector<256xf32>
    %35 = vector.shape_cast %34 : vector<256xf32> to vector<1x256xf32>
    %cst_17 = arith.constant 2.000000e+00 : f32
    %36 = vector.broadcast %cst_17 : f32 to vector<1x256xf32>
    %37 = arith.divf %35, %36 : vector<1x256xf32>
    %38 = vector.broadcast %30 : vector<1x256xf32> to vector<2x256xf32>
    %39 = arith.subf %26, %38 : vector<2x256xf32>
    %cst_18 = arith.constant 9.99999974E-6 : f32
    %40 = vector.broadcast %cst_18 : f32 to vector<1x256xf32>
    %41 = arith.addf %37, %40 : vector<1x256xf32>
    %42 = math.rsqrt %41 : vector<1x256xf32>
    %43 = vector.broadcast %42 : vector<1x256xf32> to vector<2x256xf32>
    %44 = arith.mulf %39, %43 : vector<2x256xf32>
    %45 = vector.broadcast %3 : vector<1x256xf32> to vector<2x256xf32>
    %46 = arith.mulf %44, %45 : vector<2x256xf32>
    %47 = vector.broadcast %4 : vector<1x256xf32> to vector<2x256xf32>
    %48 = arith.addf %46, %47 : vector<2x256xf32>
    %cst_19 = arith.constant 0.000000e+00 : f32
    %49 = vector.broadcast %cst_19 : f32 to vector<2x256xf32>
    %50 = arith.maximumf %48, %49 : vector<2x256xf32>
    %cst_20 = arith.constant dense<0.000000e+00> : vector<2x128xf32>
    %51 = tpu.matmul %50, %11, %cst_20 {dimension_numbers = #tpu.dot_dimension_numbers<[1], [0], [0], [1], [0, 0, 1, 1], [], []>} : vector<2x256xf32>, vector<256x128xf32>, vector<2x128xf32> -> vector<2x128xf32>
    %52 = vector.broadcast %5 : vector<1x128xf32> to vector<2x128xf32>
    %53 = arith.addf %51, %52 : vector<2x128xf32>
    %cst_21 = arith.constant dense<0.000000e+00> : vector<2x128xf32>
    %54 = tpu.matmul %53, %12, %cst_21 {dimension_numbers = #tpu.dot_dimension_numbers<[1], [0], [0], [1], [0, 0, 1, 1], [], []>} : vector<2x128xf32>, vector<128x128xf32>, vector<2x128xf32> -> vector<2x128xf32>
    %55 = vector.broadcast %6 : vector<1x128xf32> to vector<2x128xf32>
    %56 = arith.addf %54, %55 : vector<2x128xf32>
    %cst_22 = arith.constant dense<0.000000e+00> : vector<128xf32>
    %57 = vector.multi_reduction <add>, %56, %cst_22 [0] : vector<2x128xf32> to vector<128xf32>
    %58 = vector.shape_cast %57 : vector<128xf32> to vector<1x128xf32>
    %cst_23 = arith.constant 2.000000e+00 : f32
    %59 = vector.broadcast %cst_23 : f32 to vector<1x128xf32>
    %60 = arith.divf %58, %59 : vector<1x128xf32>
    %61 = vector.broadcast %60 : vector<1x128xf32> to vector<2x128xf32>
    %62 = arith.subf %56, %61 : vector<2x128xf32>
    %63 = arith.mulf %62, %62 : vector<2x128xf32>
    %cst_24 = arith.constant dense<0.000000e+00> : vector<128xf32>
    %64 = vector.multi_reduction <add>, %63, %cst_24 [0] : vector<2x128xf32> to vector<128xf32>
    %65 = vector.shape_cast %64 : vector<128xf32> to vector<1x128xf32>
    %cst_25 = arith.constant 2.000000e+00 : f32
    %66 = vector.broadcast %cst_25 : f32 to vector<1x128xf32>
    %67 = arith.divf %65, %66 : vector<1x128xf32>
    %68 = vector.broadcast %60 : vector<1x128xf32> to vector<2x128xf32>
    %69 = arith.subf %56, %68 : vector<2x128xf32>
    %cst_26 = arith.constant 9.99999974E-6 : f32
    %70 = vector.broadcast %cst_26 : f32 to vector<1x128xf32>
    %71 = arith.addf %67, %70 : vector<1x128xf32>
    %72 = math.rsqrt %71 : vector<1x128xf32>
    %73 = vector.broadcast %72 : vector<1x128xf32> to vector<2x128xf32>
    %74 = arith.mulf %69, %73 : vector<2x128xf32>
    %75 = vector.broadcast %7 : vector<1x128xf32> to vector<2x128xf32>
    %76 = arith.mulf %74, %75 : vector<2x128xf32>
    %77 = vector.broadcast %8 : vector<1x128xf32> to vector<2x128xf32>
    %78 = arith.addf %76, %77 : vector<2x128xf32>
    %cst_27 = arith.constant 0.000000e+00 : f32
    %79 = vector.broadcast %cst_27 : f32 to vector<2x128xf32>
    %80 = arith.maximumf %78, %79 : vector<2x128xf32>
    %cst_28 = arith.constant dense<0.000000e+00> : vector<2x128xf32>
    %81 = tpu.matmul %80, %13, %cst_28 {dimension_numbers = #tpu.dot_dimension_numbers<[1], [0], [0], [1], [0, 0, 1, 1], [], []>} : vector<2x128xf32>, vector<128x128xf32>, vector<2x128xf32> -> vector<2x128xf32>
    %82 = vector.broadcast %9 : vector<1x128xf32> to vector<2x128xf32>
    %83 = arith.addf %81, %82 : vector<2x128xf32>
    %84 = vector.extract_strided_slice %83 {offsets = [0, 0], sizes = [2, 64], strides = [1, 1]} : vector<2x128xf32> to vector<2x64xf32>
    %85 = arith.mulf %84, %84 : vector<2x64xf32>
    %cst_29 = arith.constant dense<0.000000e+00> : vector<2xf32>
    %86 = vector.multi_reduction <add>, %85, %cst_29 [1] : vector<2x64xf32> to vector<2xf32>
    %87 = vector.shape_cast %86 : vector<2xf32> to vector<2x1xf32>
    %cst_30 = arith.constant 1.000000e-24 : f32
    %88 = vector.broadcast %cst_30 : f32 to vector<2x1xf32>
    %89 = arith.maximumf %87, %88 : vector<2x1xf32>
    %90 = math.rsqrt %89 : vector<2x1xf32>
    %91 = vector.broadcast %90 : vector<2x1xf32> to vector<2x64xf32>
    %92 = arith.mulf %84, %91 : vector<2x64xf32>
    %93 = vector.extract_strided_slice %53 {offsets = [0, 64], sizes = [2, 64], strides = [1, 1]} : vector<2x128xf32> to vector<2x64xf32>
    %94 = arith.mulf %93, %93 : vector<2x64xf32>
    %cst_31 = arith.constant dense<0.000000e+00> : vector<2xf32>
    %95 = vector.multi_reduction <add>, %94, %cst_31 [1] : vector<2x64xf32> to vector<2xf32>
    %96 = vector.shape_cast %95 : vector<2xf32> to vector<2x1xf32>
    %cst_32 = arith.constant 1.000000e-24 : f32
    %97 = vector.broadcast %cst_32 : f32 to vector<2x1xf32>
    %98 = arith.maximumf %96, %97 : vector<2x1xf32>
    %99 = math.rsqrt %98 : vector<2x1xf32>
    %100 = vector.broadcast %99 : vector<2x1xf32> to vector<2x64xf32>
    %101 = arith.mulf %93, %100 : vector<2x64xf32>
    %102 = arith.mulf %92, %101 : vector<2x64xf32>
    %cst_33 = arith.constant dense<0.000000e+00> : vector<2xf32>
    %103 = vector.multi_reduction <add>, %102, %cst_33 [1] : vector<2x64xf32> to vector<2xf32>
    %104 = vector.shape_cast %103 : vector<2xf32> to vector<2x1xf32>
    %cst_34 = arith.constant 2.000000e+00 : f32
    %105 = vector.broadcast %cst_34 : f32 to vector<2x1xf32>
    %106 = arith.mulf %105, %104 : vector<2x1xf32>
    %cst_35 = arith.constant 2.000000e+00 : f32
    %107 = vector.broadcast %cst_35 : f32 to vector<2x1xf32>
    %108 = arith.subf %107, %106 : vector<2x1xf32>
    %109 = vector.shape_cast %108 : vector<2x1xf32> to vector<1x2x1xf32>
    %cst_36 = arith.constant dense<0.000000e+00> : vector<1xf32>
    %110 = vector.multi_reduction <add>, %109, %cst_36 [1, 2] : vector<1x2x1xf32> to vector<1xf32>
    %111 = vector.shape_cast %110 : vector<1xf32> to vector<1x1x1xf32>
    %112 = vector.extract %111[0, 0, 0] : f32 from vector<1x1x1xf32>
    %cst_37 = arith.constant 2.000000e+00 : f32
    %113 = arith.divf %112, %cst_37 : f32
    %cst_38 = arith.constant 2.000000e+00 : f32
    %114 = arith.mulf %cst_38, %113 : f32
    %115 = vector.broadcast %114 : f32 to vector<1x1xf32>
    %116 = vector.shape_cast %115 : vector<1x1xf32> to vector<1x1xf32>
    %117 = vector.broadcast %116 : vector<1x1xf32> to vector<1x128xf32>
    %c0_39 = arith.constant 0 : index
    %c0_40 = arith.constant 0 : index
    %118 = vector.load %arg5[%c0_39, %c0_40] : memref<1x128xf32, #tpu.memory_space<vmem>>, vector<1x128xf32>
    tpu.vector_store %arg5[%c0_39, %c0_40], %117 {strides = array<i32>} : memref<1x128xf32, #tpu.memory_space<vmem>>, vector<1x128xf32>,
    return
  }
}

</mosaic_0001>

<bundles_post_ra>
// kernel: byol_forward.1
= control target key start
LH: loop header
LB: loop body
LE: loop exit
PB: predicated region body
PF: predicated region fallthrough
CT: control target
= control target key end

     0   :  { %v2261_v2 = vmov 0   ;;  %s3022_s0 = inlined_call_operand.vmem [shape: bf16[128,128], index: 0, kind: input, shape index: {}]   ;;  %s3023_s1 = inlined_call_operand.vmem [shape: bf16[128,512], index: 1, kind: input, shape index: {}]   ;;  %s3024_s2 = inlined_call_operand.vmem [shape: bf16[512,256], index: 2, kind: input, shape index: {}]   ;;  %s3025_s3 = inlined_call_operand.vmem [shape: f32[512,128], index: 3, kind: input, shape index: {}]   ;;  %s3026_s4 = inlined_call_operand.vmem [shape: f32[16,512], index: 4, kind: input, shape index: {}]   ;;  %s3027_s5 = inlined_call_operand.hbm [shape: f32[1,128], index: 5, kind: output, shape index: {}]  }
   0x1   :  { %v2073_v0 = vld [vmem:[%s3023_s1 + $0x4] ss:$16 sps:$4 sm:$0xff]   ;;  %v2075_v1 = vld [vmem:[%s3023_s1] ss:$16 sps:$4 sm:$0xff]   ;;  %395 = vmatprep.mubr.bf16.mxu0 %v2261_v2  ;;  %435 = vmatprep.mubr.bf16.mxu1 %v2261_v2  ;;  %v2101_v18 = vld [vmem:[%s3023_s1 + $0xc] ss:$16 sps:$4 sm:$0xff]  }
   0x2   :  { %363 = vmatprep.subr.bf16.mxu0 %v2073_v0  ;;  %v2076_v3 = vld [vmem:[%s3023_s1 + $0x24] ss:$16 sps:$4 sm:$0xff]   ;;  %2043 = vmatprep.subr.bf16.mxu1 %v2073_v0  ;;  %v2078_v4 = vld [vmem:[%s3023_s1 + $0x20] ss:$16 sps:$4 sm:$0xff]   ;;  %v2099_v20 = vld [vmem:[%s3023_s1 + $0x8] ss:$16 sps:$4 sm:$0xff]  }
   0x3   :  { %364 = vmatpush1.bf16.msra.mxu0 %v2075_v1  ;;  %2051 = vmatpush1.bf16.msra.mxu1 %v2075_v1  ;;  %v2079_v5 = vld [vmem:[%s3023_s1 + $0x44] ss:$16 sps:$4 sm:$0xff]   ;;  %v2081_v6 = vld [vmem:[%s3023_s1 + $0x40] ss:$16 sps:$4 sm:$0xff]   ;;  %v2105_v21 = vld [vmem:[%s3023_s1 + $0x2c] ss:$16 sps:$4 sm:$0xff]  }
   0x4   :  { %365 = vmatprep.subr.bf16.mxu0 %v2076_v3  ;;  %2044 = vmatprep.subr.bf16.mxu1 %v2076_v3  ;;  %v2082_v7 = vld [vmem:[%s3023_s1 + $0x64] ss:$16 sps:$4 sm:$0xff]   ;;  %v2084_v8 = vld [vmem:[%s3023_s1 + $0x60] ss:$16 sps:$4 sm:$0xff]   ;;  %v2103_v22 = vld [vmem:[%s3023_s1 + $0x28] ss:$16 sps:$4 sm:$0xff]  }
   0x5   :  { %v2085_v9 = vld [vmem:[%s3023_s1 + $0x84] ss:$16 sps:$4 sm:$0xff]   ;;  %v2087_v10 = vld [vmem:[%s3023_s1 + $0x80] ss:$16 sps:$4 sm:$0xff]   ;;  %v2109_v23 = vld [vmem:[%s3023_s1 + $0x4c] ss:$16 sps:$4 sm:$0xff]  }
   0x6   :  { %v2088_v11 = vld [vmem:[%s3023_s1 + $0xa4] ss:$16 sps:$4 sm:$0xff]   ;;  %v2090_v12 = vld [vmem:[%s3023_s1 + $0xa0] ss:$16 sps:$4 sm:$0xff]   ;;  %v2102_v24 = vld [vmem:[%s3022_s0 + $0x8] sm:$0xff]  }
   0x7   :  { %366 = vmatpush1.bf16.msra.mxu0 %v2078_v4  ;;  %2052 = vmatpush1.bf16.msra.mxu1 %v2078_v4  ;;  %v2091_v13 = vld [vmem:[%s3023_s1 + $0xc4] ss:$16 sps:$4 sm:$0xff]   ;;  %v2093_v14 = vld [vmem:[%s3023_s1 + $0xc0] ss:$16 sps:$4 sm:$0xff]   ;;  %v2106_v25 = vld [vmem:[%s3022_s0 + $0x28] sm:$0xff]  }
   0x8   :  { %367 = vmatprep.subr.bf16.mxu0 %v2079_v5  ;;  %2045 = vmatprep.subr.bf16.mxu1 %v2079_v5  ;;  %v2094_v15 = vld [vmem:[%s3023_s1 + $0xe4] ss:$16 sps:$4 sm:$0xff]   ;;  %v2096_v16 = vld [vmem:[%s3023_s1 + $0xe0] ss:$16 sps:$4 sm:$0xff]   ;;  %v2107_v26 = vld [vmem:[%s3023_s1 + $0x48] ss:$16 sps:$4 sm:$0xff]  }
   0x9   :  { %v2097_v17 = vld [vmem:[%s3022_s0] sm:$0xff]   ;;  %v2113_v27 = vld [vmem:[%s3023_s1 + $0x6c] ss:$16 sps:$4 sm:$0xff]   ;;  %v2111_v28 = vld [vmem:[%s3023_s1 + $0x68] ss:$16 sps:$4 sm:$0xff]  }
   0xa   :  { %v2356_v19 = vld [vmem:[%s3022_s0 + $0x20] sm:$0xff]   ;;  %v2117_v29 = vld [vmem:[%s3023_s1 + $0x8c] ss:$16 sps:$4 sm:$0xff]   ;;  %v2110_v30 = vld [vmem:[%s3022_s0 + $0x10] sm:$0xff]  }
   0xb   :  { %368 = vmatpush1.bf16.msra.mxu0 %v2081_v6  ;;  %2053 = vmatpush1.bf16.msra.mxu1 %v2081_v6  ;;  %v2114_v31 = vld [vmem:[%s3022_s0 + $0x30] sm:$0xff]   ;;  %v2115_v32 = vld [vmem:[%s3023_s1 + $0x88] ss:$16 sps:$4 sm:$0xff]   ;;  %v2121_v33 = vld [vmem:[%s3023_s1 + $0xac] ss:$16 sps:$4 sm:$0xff]  }
   0xc   :  { %369 = vmatprep.subr.bf16.mxu0 %v2082_v7  ;;  %2046 = vmatprep.subr.bf16.mxu1 %v2082_v7  ;;  %v2119_v34 = vld [vmem:[%s3023_s1 + $0xa8] ss:$16 sps:$4 sm:$0xff]  }
   0xf   :  { %370 = vmatpush1.bf16.msra.mxu0 %v2084_v8  ;;  %2054 = vmatpush1.bf16.msra.mxu1 %v2084_v8 }
  0x10   :  { %371 = vmatprep.subr.bf16.mxu0 %v2085_v9  ;;  %2047 = vmatprep.subr.bf16.mxu1 %v2085_v9 }
  0x13   :  { %372 = vmatpush1.bf16.msra.mxu0 %v2087_v10  ;;  %2055 = vmatpush1.bf16.msra.mxu1 %v2087_v10 }
  0x14   :  { %373 = vmatprep.subr.bf16.mxu0 %v2088_v11  ;;  %2048 = vmatprep.subr.bf16.mxu1 %v2088_v11 }
  0x17   :  { %374 = vmatpush1.bf16.msra.mxu0 %v2090_v12  ;;  %2056 = vmatpush1.bf16.msra.mxu1 %v2090_v12 }
  0x18   :  { %375 = vmatprep.subr.bf16.mxu0 %v2091_v13  ;;  %2049 = vmatprep.subr.bf16.mxu1 %v2091_v13 }
  0x1b   :  { %376 = vmatpush1.bf16.msra.mxu0 %v2093_v14  ;;  %2057 = vmatpush1.bf16.msra.mxu1 %v2093_v14 }
  0x1c   :  { %377 = vmatprep.subr.bf16.mxu0 %v2094_v15  ;;  %2050 = vmatprep.subr.bf16.mxu1 %v2094_v15 }
  0x1f   :  { %378 = vmatpush1.bf16.msra.mxu0 %v2096_v16  ;;  %2058 = vmatpush1.bf16.msra.mxu1 %v2096_v16 }
  0x20   :  { %476 = vmatprep.subr.bf16.mxu1 %v2101_v18 }
  0x22   :  { %396 = vmatmul.mubr.bf16.vlgmr.msra.gmra.mrb[0].mxu0 %v2097_v17  ;;  %436 = vmatmul.mubr.bf16.vlgmr.msra.gmra.mrb[0].mxu1 %v2356_v19 }
  0x23   :  { %405 = vmatprep.mubr.bf16.mxu0 %v2261_v2  ;;  %477 = vmatpush1.bf16.msra.mxu1 %v2099_v20 }
  0x24   :  { %478 = vmatprep.subr.bf16.mxu1 %v2105_v21  ;;  %445 = vmatprep.mubr.bf16.mxu1 %v2261_v2 }
  0x27   :  { %479 = vmatpush1.bf16.msra.mxu1 %v2103_v22 }
  0x28   :  { %480 = vmatprep.subr.bf16.mxu1 %v2109_v23 }
  0x2a   :  { %406 = vmatmul.mubr.bf16.gmra.mrb[4].mxu0 %v2102_v24  ;;  %446 = vmatmul.mubr.bf16.gmra.mrb[4].mxu1 %v2106_v25 }
  0x2b   :  { %415 = vmatprep.mubr.bf16.mxu0 %v2261_v2  ;;  %481 = vmatpush1.bf16.msra.mxu1 %v2107_v26 }
  0x2c   :  { %482 = vmatprep.subr.bf16.mxu1 %v2113_v27  ;;  %455 = vmatprep.mubr.bf16.mxu1 %v2261_v2 }
  0x2f   :  { %483 = vmatpush1.bf16.msra.mxu1 %v2111_v28 }
  0x30   :  { %484 = vmatprep.subr.bf16.mxu1 %v2117_v29 }
  0x32   :  { %416 = vmatmul.mubr.bf16.gmra.mrb[8].mxu0 %v2110_v30  ;;  %456 = vmatmul.mubr.bf16.gmra.mrb[8].mxu1 %v2114_v31 }
  0x33   :  { %425 = vmatprep.mubr.bf16.mxu0 %v2261_v2  ;;  %485 = vmatpush1.bf16.msra.mxu1 %v2115_v32 }
  0x34   :  { %10 = vsyncpa [#allocation3], 0  ;;  %486 = vmatprep.subr.bf16.mxu1 %v2121_v33  ;;  %465 = vmatprep.mubr.bf16.mxu1 %v2261_v2  ;;  %v2125_v35 = vld [vmem:[%s3023_s1 + $0xcc] ss:$16 sps:$4 sm:$0xff]   ;;  %v2123_v38 = vld [vmem:[%s3023_s1 + $0xc8] ss:$16 sps:$4 sm:$0xff]   ;;  %v139_v42 = vlaneseq }
  0x35   :  { %v2118_v36 = vld [vmem:[%s3022_s0 + $0x18] sm:$0xff]   ;;  %v2262_v41 = vmov 0.0   ;;  %v2447_v45 = vld [vmem:[%s3026_s4] sm:$0xff]  ;;  %v2452_v46 = vld [vmem:[%s3026_s4 + $0x8] sm:$0xff]  ;;  %vm1276_vm0 = vcmask 1041408   ;;  %vm2264_vm1 = vmmov 0  }
  0x36   :  { %v2122_v37 = vld [vmem:[%s3022_s0 + $0x38] sm:$0xff]   ;;  %v2439_v43 = vshrl.u32 %v139_v42, 7  ;;  %s2265_s13 = smov 64   ;;  %vm1597_vm2 = vcmask 517120   ;;  %vm1625_vm3 = vcmask 1024   ;;  %s2266_s17 = smov [#allocation2]  }
  0x37   :  { %487 = vmatpush1.bf16.msra.mxu1 %v2119_v34  ;;  %v2128_v39 = vld [vmem:[%s3023_s1 + $0xec] ss:$16 sps:$4 sm:$0xff]   ;;  %v2126_v40 = vld [vmem:[%s3023_s1 + $0xe8] ss:$16 sps:$4 sm:$0xff]   ;;  %s1648_s18 = sshll.u32 %s2266_s17, 4  ;;  %s1649_s18 = int_to_ptr.vmem [resolvable:$true] %s1648_s18 }
  0x38   :  { %488 = vmatprep.subr.bf16.mxu1 %v2125_v35  ;;  %v2442_v44 = vsub.s32 0, %v2439_v43  ;;  %s2237_s20 = scalar_lea.vmem %s1649_s18, 16  ;;  %s2241_s21 = scalar_lea.vmem %s1649_s18, 32 }
  0x39   :  { %p2238_p0 = scmp.ne.s32.totalorder %s1649_s18, %s2237_s20  ;;  %p2242_p1 = scmp.lt.s32.totalorder %s1649_s18, %s1649_s18 }
  0x3a   :  { %426 = vmatmul.mubr.bf16.gmra.mrb[12].mxu0 %v2118_v36  ;;  %466 = vmatmul.mubr.bf16.gmra.mrb[12].mxu1 %v2122_v37  ;;  %v2456_v47 = vrot.slane %v2447_v45, %v2442_v44  ;;  %v2460_v48 = vrot.slane %v2452_v46, %v2442_v44  ;;  %p2243_p2 = scmp.lt.s32.totalorder %s2241_s21, %s2237_s20 }
  0x3b   :  { %489 = vmatpush1.bf16.msra.mxu1 %v2123_v38  ;;  %508 = vmatprep.mubr.bf16.mxu1 %v2261_v2 }
  0x3c   :  { %490 = vmatprep.subr.bf16.mxu1 %v2128_v39  ;;  %720 = vmatprep.mubr.f32.mxu0 %v2262_v41  ;;  %p2244_p3 = por %p2243_p2, %p2242_p1 }
  0x3e   :  { %p2245_p4 = pnand %p2244_p3, %p2238_p0 }
  0x3f   :  { %491 = vmatpush1.bf16.msra.mxu1 %v2126_v40 }
  0x42   :  { %509 = vmatmul.mubr.bf16.vlgmr.msra.gmra.mrb[16].mxu1 %v2097_v17 }
  0x43   :  { %518 = vmatprep.mubr.bf16.mxu1 %v2261_v2 }
  0x4a   :  { %519 = vmatmul.mubr.bf16.gmra.mrb[20].mxu1 %v2102_v24 }
  0x4b   :  { %528 = vmatprep.mubr.bf16.mxu1 %v2261_v2 }
  0x52   :  { %529 = vmatmul.mubr.bf16.gmra.mrb[24].mxu1 %v2110_v30 }
  0x53   :  { %538 = vmatprep.mubr.bf16.mxu1 %v2261_v2 }
  0x5a   :  { %539 = vmatmul.mubr.bf16.gmra.mrb[28].mxu1 %v2118_v36 }
  0x5b   :  { %548 = vmatprep.mubr.bf16.mxu1 %v2261_v2 }
  0x62   :  { %549 = vmatmul.mubr.bf16.gmra.mrb[32].mxu1 %v2356_v19 }
  0x63   :  { %558 = vmatprep.mubr.bf16.mxu1 %v2261_v2 }
  0x6a   :  { %559 = vmatmul.mubr.bf16.gmra.mrb[36].mxu1 %v2106_v25 }
  0x6b   :  { %568 = vmatprep.mubr.bf16.mxu1 %v2261_v2 }
  0x72   :  { %569 = vmatmul.mubr.bf16.gmra.mrb[40].mxu1 %v2114_v31 }
  0x73   :  { %578 = vmatprep.mubr.bf16.mxu1 %v2261_v2 }
  0x7a   :  { %579 = vmatmul.mubr.bf16.gmra.mrb[44].mxu1 %v2122_v37 }
  0x7b   :  { %791 = vmatprep.mubr.f32.mxu1 %v2262_v41 }
  0xf5   :  { %v397_v49 = vpop.f32.mrb[0].mxu0  ;;  %v437_v50 = vpop.f32.mrb[0].mxu1 }
  0xf6   :  { %v398_v51 = vadd.f32 %v397_v49, %v2456_v47  ;;  %v399_v52 = vpop.f32.mrb[1].mxu0  ;;  %v438_v53 = vadd.f32 %v437_v50, %v2456_v47  ;;  %v439_v54 = vpop.f32.mrb[1].mxu1 }
  0xf7   :  { %v400_v55 = vadd.f32 %v399_v52, %v2460_v48  ;;  %v401_v56 = vpop.f32.mrb[2].mxu0  ;;  %v440_v57 = vadd.f32 %v439_v54, %v2460_v48  ;;  %v441_v58 = vpop.f32.mrb[2].mxu1 }
  0xf8   :  { %v402_v59 = vadd.f32 %v401_v56, %v2456_v47  ;;  %v403_v60 = vpop.f32.mrb[3].mxu0  ;;  %v621_v61 = vmax.f32 %v438_v53, 0.0  ;;  %v442_v62 = vadd.f32 %v441_v58, %v2456_v47  ;;  %v443_v63 = vpop.f32.mrb[3].mxu1  ;;  %v589_v3 = vmax.f32 %v398_v51, 0.0 }
  0xf9   :  { %v404_v0 = vadd.f32 %v403_v60, %v2460_v48  ;;  %v622_v1 = vmax.f32 %v440_v57, 0.0  ;;  %v444_v2 = vadd.f32 %v443_v63, %v2460_v48  ;;  %v590_v6 = vmax.f32 %v400_v55, 0.0 }
  0xfa   :  { %v593_v4 = vmax.f32 %v402_v59, 0.0  ;;  %v625_v5 = vmax.f32 %v442_v62, 0.0 }
  0xfb   :  { %v594_v7 = vmax.f32 %v404_v0, 0.0  ;;  %v626_v8 = vmax.f32 %v444_v2, 0.0 }
  0xfc   :  { %v1901_v9 = vpack.c.bf16 %v593_v4, %v589_v3  ;;  %v2470_v10 = vpack.c.bf16 %v625_v5, %v621_v61 }
  0xfd   :  { %v1899_v11 = vpack.c.bf16 %v594_v7, %v590_v6  ;;  %v407_v12 = vpop.f32.mrb[4].mxu0  ;;  %v2472_v13 = vpack.c.bf16 %v626_v8, %v622_v1  ;;  %v447_v14 = vpop.f32.mrb[4].mxu1 }
  0xfe   :  { %v408_v15 = vadd.f32 %v407_v12, %v2456_v47  ;;  %v409_v16 = vpop.f32.mrb[5].mxu0  ;;  %v448_v17 = vadd.f32 %v447_v14, %v2456_v47  ;;  %v449_v18 = vpop.f32.mrb[5].mxu1 }
  0xff   :  { %v410_v19 = vadd.f32 %v409_v16, %v2460_v48  ;;  %v411_v20 = vpop.f32.mrb[6].mxu0  ;;  %1900 = vmatprep.subr.bf16.mxu0 %v1899_v11  ;;  %v450_v21 = vadd.f32 %v449_v18, %v2460_v48  ;;  %v451_v22 = vpop.f32.mrb[6].mxu1 }
 0x100   :  { %v412_v23 = vadd.f32 %v411_v20, %v2456_v47  ;;  %v413_v24 = vpop.f32.mrb[7].mxu0  ;;  %1902 = vmatpush1.bf16.msra.mxu0 %v1901_v9  ;;  %v629_v25 = vmax.f32 %v448_v17, 0.0  ;;  %v452_v26 = vadd.f32 %v451_v22, %v2456_v47  ;;  %v453_v27 = vpop.f32.mrb[7].mxu1  ;;  %v597_v31 = vmax.f32 %v408_v15, 0.0 }
 0x101   :  { %v414_v28 = vadd.f32 %v413_v24, %v2460_v48  ;;  %v630_v29 = vmax.f32 %v450_v21, 0.0  ;;  %v454_v30 = vadd.f32 %v453_v27, %v2460_v48  ;;  %v598_v34 = vmax.f32 %v410_v19, 0.0  ;;  %v24_v24 = vld [vmem:[%s3026_s4 + $0x10] sm:$0xff] }
 0x102   :  { %v601_v32 = vmax.f32 %v412_v23, 0.0  ;;  %v633_v33 = vmax.f32 %v452_v26, 0.0 }
 0x103   :  { %v602_v35 = vmax.f32 %v414_v28, 0.0  ;;  %v634_v36 = vmax.f32 %v454_v30, 0.0  ;;  %v25_v30 = vld [vmem:[%s3026_s4 + $0x18] sm:$0xff] }
 0x104   :  { %v1905_v37 = vpack.c.bf16 %v601_v32, %v597_v31  ;;  %v2482_v38 = vpack.c.bf16 %v633_v33, %v629_v25 }
 0x105   :  { %v1903_v39 = vpack.c.bf16 %v602_v35, %v598_v34  ;;  %v417_v40 = vpop.f32.mrb[8].mxu0  ;;  %v2484_v42 = vpack.c.bf16 %v634_v36, %v630_v29  ;;  %v457_v49 = vpop.f32.mrb[8].mxu1 }
 0x106   :  { %v418_v50 = vadd.f32 %v417_v40, %v2456_v47  ;;  %v419_v51 = vpop.f32.mrb[9].mxu0  ;;  %v458_v52 = vadd.f32 %v457_v49, %v2456_v47  ;;  %v459_v53 = vpop.f32.mrb[9].mxu1 }
 0x107   :  { %v420_v54 = vadd.f32 %v419_v51, %v2460_v48  ;;  %v421_v55 = vpop.f32.mrb[10].mxu0  ;;  %1904 = vmatprep.subr.bf16.mxu0 %v1903_v39  ;;  %v460_v56 = vadd.f32 %v459_v53, %v2460_v48  ;;  %v461_v57 = vpop.f32.mrb[10].mxu1 }
 0x108   :  { %v422_v58 = vadd.f32 %v421_v55, %v2456_v47  ;;  %v423_v59 = vpop.f32.mrb[11].mxu0  ;;  %1906 = vmatpush1.bf16.msra.mxu0 %v1905_v37  ;;  %v637_v60 = vmax.f32 %v458_v52, 0.0  ;;  %v462_v61 = vadd.f32 %v461_v57, %v2456_v47  ;;  %v463_v62 = vpop.f32.mrb[11].mxu1  ;;  %v605_v2 = vmax.f32 %v418_v50, 0.0 }
 0x109   :  { %v424_v63 = vadd.f32 %v423_v59, %v2460_v48  ;;  %v638_v0 = vmax.f32 %v460_v56, 0.0  ;;  %v464_v1 = vadd.f32 %v463_v62, %v2460_v48  ;;  %v606_v5 = vmax.f32 %v420_v54, 0.0 }
 0x10a   :  { %v609_v3 = vmax.f32 %v422_v58, 0.0  ;;  %v641_v4 = vmax.f32 %v462_v61, 0.0  ;;  %v2513_v37 = vrot.slane %v24_v24, %v2442_v44 }
 0x10b   :  { %v610_v6 = vmax.f32 %v424_v63, 0.0  ;;  %v642_v7 = vmax.f32 %v464_v1, 0.0 }
 0x10c   :  { %v1909_v8 = vpack.c.bf16 %v609_v3, %v605_v2  ;;  %v2494_v9 = vpack.c.bf16 %v641_v4, %v637_v60 }
 0x10d   :  { %v1907_v11 = vpack.c.bf16 %v610_v6, %v606_v5  ;;  %v427_v12 = vpop.f32.mrb[12].mxu0  ;;  %v2496_v14 = vpack.c.bf16 %v642_v7, %v638_v0  ;;  %v467_v15 = vpop.f32.mrb[12].mxu1 }
 0x10e   :  { %v428_v16 = vadd.f32 %v427_v12, %v2456_v47  ;;  %v429_v17 = vpop.f32.mrb[13].mxu0  ;;  %v468_v18 = vadd.f32 %v467_v15, %v2456_v47  ;;  %v469_v19 = vpop.f32.mrb[13].mxu1 }
 0x10f   :  { %v430_v20 = vadd.f32 %v429_v17, %v2460_v48  ;;  %v431_v21 = vpop.f32.mrb[14].mxu0  ;;  %1908 = vmatprep.subr.bf16.mxu0 %v1907_v11  ;;  %v470_v22 = vadd.f32 %v469_v19, %v2460_v48  ;;  %v471_v23 = vpop.f32.mrb[14].mxu1  ;;  %v2535_v17 = vld [vmem:[%s3026_s4 + $0x20] sm:$0xff] }
 0x110   :  { %v432_v25 = vadd.f32 %v431_v21, %v2456_v47  ;;  %v433_v26 = vpop.f32.mrb[15].mxu0  ;;  %1910 = vmatpush1.bf16.msra.mxu0 %v1909_v8  ;;  %v645_v27 = vmax.f32 %v468_v18, 0.0  ;;  %v472_v28 = vadd.f32 %v471_v23, %v2456_v47  ;;  %v473_v29 = vpop.f32.mrb[15].mxu1  ;;  %v613_v34 = vmax.f32 %v428_v16, 0.0 }
 0x111   :  { %v434_v31 = vadd.f32 %v433_v26, %v2460_v48  ;;  %v646_v32 = vmax.f32 %v470_v22, 0.0  ;;  %v474_v33 = vadd.f32 %v473_v29, %v2460_v48  ;;  %v614_v39 = vmax.f32 %v430_v20, 0.0  ;;  %v2129_v26 = vld [vmem:[%s3024_s2] ss:$8 sps:$4 sm:$0xff]   ;;  %v2134_v29 = vld [vmem:[%s3024_s2 + $0x14] ss:$8 sps:$4 sm:$0xff]  }
 0x112   :  { %v617_v35 = vmax.f32 %v432_v25, 0.0  ;;  %v649_v36 = vmax.f32 %v472_v28, 0.0  ;;  %v2516_v47 = vrot.slane %v25_v30, %v2442_v44  ;;  %v654_v21 = vrot.slane %v2535_v17, 1 }
 0x113   :  { %v618_v40 = vmax.f32 %v434_v31, 0.0  ;;  %v650_v49 = vmax.f32 %v474_v33, 0.0  ;;  %v2132_v33 = vld [vmem:[%s3024_s2 + $0x10] ss:$8 sps:$4 sm:$0xff]  }
 0x114   :  { %v1913_v50 = vpack.c.bf16 %v617_v35, %v613_v34  ;;  %v1929_v51 = vpack.c.bf16 %v649_v36, %v645_v27  ;;  %v2137_v36 = vld [vmem:[%s3024_s2 + $0x24] ss:$8 sps:$4 sm:$0xff]  }
 0x115   :  { %v1911_v52 = vpack.c.bf16 %v618_v40, %v614_v39  ;;  %v1927_v53 = vpack.c.bf16 %v650_v49, %v646_v32  ;;  %v510_v54 = vpop.f32.mrb[16].mxu1 }
 0x116   :  { %v511_v55 = vadd.f32 %v510_v54, %v2513_v37  ;;  %v512_v48 = vpop.f32.mrb[17].mxu1  ;;  %v2135_v54 = vld [vmem:[%s3024_s2 + $0x20] ss:$8 sps:$4 sm:$0xff]  }
 0x117   :  { %1912 = vmatprep.subr.bf16.mxu0 %v1911_v52  ;;  %v513_v56 = vadd.f32 %v512_v48, %v2516_v47  ;;  %v514_v57 = vpop.f32.mrb[18].mxu1 }
 0x118   :  { %1914 = vmatpush1.bf16.msra.mxu0 %v1913_v50  ;;  %v591_v58 = vmax.f32 %v511_v55, 0.0  ;;  %v515_v59 = vadd.f32 %v514_v57, %v2513_v37  ;;  %v516_v60 = vpop.f32.mrb[19].mxu1 }
 0x119   :  { %1916 = vmatprep.subr.bf16.mxu0 %v2472_v13  ;;  %v592_v61 = vmax.f32 %v513_v56, 0.0  ;;  %v517_v62 = vadd.f32 %v516_v60, %v2516_v47  ;;  %v2140_v56 = vld [vmem:[%s3024_s2 + $0x34] ss:$8 sps:$4 sm:$0xff]   ;;  %v2138_v60 = vld [vmem:[%s3024_s2 + $0x30] ss:$8 sps:$4 sm:$0xff]  }
 0x11a   :  { %v595_v63 = vmax.f32 %v515_v59, 0.0 }
 0x11b   :  { %v596_v0 = vmax.f32 %v517_v62, 0.0 }
 0x11c   :  { %1918 = vmatpush1.bf16.msra.mxu0 %v2470_v10  ;;  %v1933_v1 = vpack.c.bf16 %v595_v63, %v591_v58  ;;  %v2143_v63 = vld [vmem:[%s3024_s2 + $0x44] ss:$8 sps:$4 sm:$0xff]  }
 0x11d   :  { %1920 = vmatprep.subr.bf16.mxu0 %v2484_v42  ;;  %v1931_v2 = vpack.c.bf16 %v596_v0, %v592_v61  ;;  %v520_v3 = vpop.f32.mrb[20].mxu1 }
 0x11e   :  { %v521_v4 = vadd.f32 %v520_v3, %v2513_v37  ;;  %v522_v5 = vpop.f32.mrb[21].mxu1 }
 0x11f   :  { %v523_v6 = vadd.f32 %v522_v5, %v2516_v47  ;;  %v524_v7 = vpop.f32.mrb[22].mxu1  ;;  %1932 = vmatprep.subr.bf16.mxu1 %v1931_v2 }
 0x120   :  { %1922 = vmatpush1.bf16.msra.mxu0 %v2482_v38  ;;  %v599_v13 = vmax.f32 %v521_v4, 0.0  ;;  %v525_v8 = vadd.f32 %v524_v7, %v2513_v37  ;;  %v526_v11 = vpop.f32.mrb[23].mxu1  ;;  %1934 = vmatpush1.bf16.msra.mxu1 %v1933_v1  ;;  %v2141_v7 = vld [vmem:[%s3024_s2 + $0x40] ss:$8 sps:$4 sm:$0xff]  }
 0x121   :  { %1924 = vmatprep.subr.bf16.mxu0 %v2496_v14  ;;  %v600_v10 = vmax.f32 %v523_v6, 0.0  ;;  %v527_v42 = vadd.f32 %v526_v11, %v2516_v47  ;;  %v2131_v14 = vld [vmem:[%s3024_s2 + $0x4] ss:$8 sps:$4 sm:$0xff]   ;;  %v2146_v11 = vld [vmem:[%s3024_s2 + $0x54] ss:$8 sps:$4 sm:$0xff]  }
 0x122   :  { %v603_v12 = vmax.f32 %v525_v8, 0.0 }
 0x123   :  { %v604_v15 = vmax.f32 %v527_v42, 0.0 }
 0x124   :  { %1926 = vmatpush1.bf16.msra.mxu0 %v2494_v9  ;;  %v1937_v16 = vpack.c.bf16 %v603_v12, %v599_v13 }
 0x125   :  { %1928 = vmatprep.subr.bf16.mxu0 %v1927_v53  ;;  %v1935_v38 = vpack.c.bf16 %v604_v15, %v600_v10  ;;  %v530_v18 = vpop.f32.mrb[24].mxu1  ;;  %v2144_v15 = vld [vmem:[%s3024_s2 + $0x50] ss:$8 sps:$4 sm:$0xff]  }
 0x126   :  { %v531_v19 = vadd.f32 %v530_v18, %v2513_v37  ;;  %v532_v20 = vpop.f32.mrb[25].mxu1  ;;  %v2149_v18 = vld [vmem:[%s3024_s2 + $0x64] ss:$8 sps:$4 sm:$0xff]  }
 0x127   :  { %v533_v9 = vadd.f32 %v532_v20, %v2516_v47  ;;  %v534_v22 = vpop.f32.mrb[26].mxu1  ;;  %1936 = vmatprep.subr.bf16.mxu1 %v1935_v38 }
 0x128   :  { %1930 = vmatpush1.bf16.msra.mxu0 %v1929_v51  ;;  %v607_v23 = vmax.f32 %v531_v19, 0.0  ;;  %v535_v24 = vadd.f32 %v534_v22, %v2513_v37  ;;  %v536_v25 = vpop.f32.mrb[27].mxu1  ;;  %1938 = vmatpush1.bf16.msra.mxu1 %v1937_v16 }
 0x129   :  { %v608_v27 = vmax.f32 %v533_v9, 0.0  ;;  %v537_v28 = vadd.f32 %v536_v25, %v2516_v47  ;;  %1194 = vmatprep.subr.bf16.mxu0 %v2131_v14  ;;  %v2147_v25 = vld [vmem:[%s3024_s2 + $0x60] ss:$8 sps:$4 sm:$0xff]  }
 0x12a   :  { %v611_v30 = vmax.f32 %v535_v24, 0.0 }
 0x12b   :  { %721 = vmatmul.mubr.f32.vlgmr.msra.gmra.mrb[16].mxu0 %v654_v21  ;;  %v612_v31 = vmax.f32 %v537_v28, 0.0  ;;  %v2152_v28 = vld [vmem:[%s3024_s2 + $0x74] ss:$8 sps:$4 sm:$0xff]  }
 0x12c   :  { %v1941_v32 = vpack.c.bf16 %v611_v30, %v607_v23  ;;  %1195 = vmatpush1.bf16.msra.mxu0 %v2129_v26 }
 0x12d   :  { %v1939_v34 = vpack.c.bf16 %v612_v31, %v608_v27  ;;  %v540_v35 = vpop.f32.mrb[28].mxu1  ;;  %1196 = vmatprep.subr.bf16.mxu0 %v2134_v29 }
 0x12e   :  { %v541_v39 = vadd.f32 %v540_v35, %v2513_v37  ;;  %v542_v40 = vpop.f32.mrb[29].mxu1  ;;  %v2155_v35 = vld [vmem:[%s3024_s2 + $0x84] ss:$8 sps:$4 sm:$0xff]  }
 0x12f   :  { %v543_v49 = vadd.f32 %v542_v40, %v2516_v47  ;;  %v544_v50 = vpop.f32.mrb[30].mxu1  ;;  %1940 = vmatprep.subr.bf16.mxu1 %v1939_v34 }
 0x130   :  { %v615_v51 = vmax.f32 %v541_v39, 0.0  ;;  %v545_v52 = vadd.f32 %v544_v50, %v2513_v37  ;;  %v546_v53 = vpop.f32.mrb[31].mxu1  ;;  %1942 = vmatpush1.bf16.msra.mxu1 %v1941_v32  ;;  %1197 = vmatpush1.bf16.msra.mxu0 %v2132_v33  ;;  %v2150_v32 = vld [vmem:[%s3024_s2 + $0x70] ss:$8 sps:$4 sm:$0xff]  }
 0x131   :  { %v616_v55 = vmax.f32 %v543_v49, 0.0  ;;  %v547_v48 = vadd.f32 %v546_v53, %v2516_v47  ;;  %1198 = vmatprep.subr.bf16.mxu0 %v2137_v36  ;;  %v2153_v53 = vld [vmem:[%s3024_s2 + $0x80] ss:$8 sps:$4 sm:$0xff]  }
 0x132   :  { %v619_v57 = vmax.f32 %v545_v52, 0.0 }
 0x133   :  { %v620_v58 = vmax.f32 %v547_v48, 0.0  ;;  %v2158_v48 = vld [vmem:[%s3024_s2 + $0x94] ss:$8 sps:$4 sm:$0xff]  }
 0x134   :  { %v1945_v59 = vpack.c.bf16 %v619_v57, %v615_v51  ;;  %1199 = vmatpush1.bf16.msra.mxu0 %v2135_v54 }
 0x135   :  { %v1943_v61 = vpack.c.bf16 %v620_v58, %v616_v55  ;;  %v550_v62 = vpop.f32.mrb[32].mxu1  ;;  %1200 = vmatprep.subr.bf16.mxu0 %v2140_v56 }
 0x136   :  { %v551_v0 = vadd.f32 %v550_v62, %v2513_v37  ;;  %v552_v1 = vpop.f32.mrb[33].mxu1  ;;  %v2161_v62 = vld [vmem:[%s3024_s2 + $0xa4] ss:$8 sps:$4 sm:$0xff]  }
 0x137   :  { %v553_v2 = vadd.f32 %v552_v1, %v2516_v47  ;;  %v554_v3 = vpop.f32.mrb[34].mxu1  ;;  %1944 = vmatprep.subr.bf16.mxu1 %v1943_v61 }
 0x138   :  { %v623_v4 = vmax.f32 %v551_v0, 0.0  ;;  %v555_v5 = vadd.f32 %v554_v3, %v2513_v37  ;;  %v556_v6 = vpop.f32.mrb[35].mxu1  ;;  %1946 = vmatpush1.bf16.msra.mxu1 %v1945_v59  ;;  %1201 = vmatpush1.bf16.msra.mxu0 %v2138_v60  ;;  %v2156_v59 = vld [vmem:[%s3024_s2 + $0x90] ss:$8 sps:$4 sm:$0xff]  }
 0x139   :  { %v624_v13 = vmax.f32 %v553_v2, 0.0  ;;  %v557_v8 = vadd.f32 %v556_v6, %v2516_v47  ;;  %1202 = vmatprep.subr.bf16.mxu0 %v2143_v63  ;;  %v2159_v6 = vld [vmem:[%s3024_s2 + $0xa0] ss:$8 sps:$4 sm:$0xff]  }
 0x13a   :  { %v627_v10 = vmax.f32 %v555_v5, 0.0 }
 0x13b   :  { %v628_v42 = vmax.f32 %v557_v8, 0.0  ;;  %v2164_v8 = vld [vmem:[%s3024_s2 + $0xb4] ss:$8 sps:$4 sm:$0xff]  }
 0x13c   :  { %v1949_v12 = vpack.c.bf16 %v627_v10, %v623_v4  ;;  %1203 = vmatpush1.bf16.msra.mxu0 %v2141_v7 }
 0x13d   :  { %v1947_v16 = vpack.c.bf16 %v628_v42, %v624_v13  ;;  %v560_v38 = vpop.f32.mrb[36].mxu1  ;;  %1204 = vmatprep.subr.bf16.mxu0 %v2146_v11 }
 0x13e   :  { %v561_v14 = vadd.f32 %v560_v38, %v2513_v37  ;;  %v562_v19 = vpop.f32.mrb[37].mxu1  ;;  %v2168_v38 = vld [vmem:[%s3024_s2 + $0xd0] ss:$8 sps:$4 sm:$0xff]  }
 0x13f   :  { %v563_v20 = vadd.f32 %v562_v19, %v2516_v47  ;;  %v564_v9 = vpop.f32.mrb[38].mxu1  ;;  %1948 = vmatprep.subr.bf16.mxu1 %v1947_v16  ;;  %v2170_v16 = vld [vmem:[%s3024_s2 + $0xd4] ss:$8 sps:$4 sm:$0xff]   ;;  %v2174_v19 = vld [vmem:[%s3024_s2 + $0xf0] ss:$8 sps:$4 sm:$0xff]  }
 0x140   :  { %v631_v22 = vmax.f32 %v561_v14, 0.0  ;;  %v565_v23 = vadd.f32 %v564_v9, %v2513_v37  ;;  %v566_v24 = vpop.f32.mrb[39].mxu1  ;;  %1950 = vmatpush1.bf16.msra.mxu1 %v1949_v12  ;;  %1205 = vmatpush1.bf16.msra.mxu0 %v2144_v15  ;;  %v2167_v15 = vld [vmem:[%s3024_s2 + $0xc4] ss:$8 sps:$4 sm:$0xff]   ;;  %v2171_v14 = vld [vmem:[%s3024_s2 + $0xe0] ss:$8 sps:$4 sm:$0xff]  }
 0x141   :  { %v632_v26 = vmax.f32 %v563_v20, 0.0  ;;  %v567_v27 = vadd.f32 %v566_v24, %v2516_v47  ;;  %1206 = vmatprep.subr.bf16.mxu0 %v2149_v18  ;;  %v2173_v18 = vld [vmem:[%s3024_s2 + $0xe4] ss:$8 sps:$4 sm:$0xff]   ;;  %v2177_v24 = vld [vmem:[%s3024_s2 + $0x100] ss:$8 sps:$4 sm:$0xff]  }
 0x142   :  { %v635_v29 = vmax.f32 %v565_v23, 0.0  ;;  %v2179_v20 = vld [vmem:[%s3024_s2 + $0x104] ss:$8 sps:$4 sm:$0xff]  }
 0x143   :  { %v636_v30 = vmax.f32 %v567_v27, 0.0  ;;  %v2180_v27 = vld [vmem:[%s3024_s2 + $0x110] ss:$8 sps:$4 sm:$0xff]  }
 0x144   :  { %v1953_v31 = vpack.c.bf16 %v635_v29, %v631_v22  ;;  %1207 = vmatpush1.bf16.msra.mxu0 %v2147_v25  ;;  %v2183_v29 = vld [vmem:[%s3024_s2 + $0x120] ss:$8 sps:$4 sm:$0xff]  }
 0x145   :  { %v1951_v33 = vpack.c.bf16 %v636_v30, %v632_v26  ;;  %v570_v34 = vpop.f32.mrb[40].mxu1  ;;  %1208 = vmatprep.subr.bf16.mxu0 %v2152_v28  ;;  %v2182_v26 = vld [vmem:[%s3024_s2 + $0x114] ss:$8 sps:$4 sm:$0xff]   ;;  %v2185_v28 = vld [vmem:[%s3024_s2 + $0x124] ss:$8 sps:$4 sm:$0xff]  }
 0x146   :  { %v571_v36 = vadd.f32 %v570_v34, %v2513_v37  ;;  %v572_v39 = vpop.f32.mrb[41].mxu1  ;;  %v2188_v30 = vld [vmem:[%s3024_s2 + $0x134] ss:$8 sps:$4 sm:$0xff]  }
 0x147   :  { %v573_v40 = vadd.f32 %v572_v39, %v2516_v47  ;;  %v574_v49 = vpop.f32.mrb[42].mxu1  ;;  %1952 = vmatprep.subr.bf16.mxu1 %v1951_v33  ;;  %v2189_v33 = vld [vmem:[%s3024_s2 + $0x140] ss:$8 sps:$4 sm:$0xff]   ;;  %v2194_v34 = vld [vmem:[%s3024_s2 + $0x154] ss:$8 sps:$4 sm:$0xff]  }
 0x148   :  { %v639_v50 = vmax.f32 %v571_v36, 0.0  ;;  %v575_v51 = vadd.f32 %v574_v49, %v2513_v37  ;;  %v576_v52 = vpop.f32.mrb[43].mxu1  ;;  %1954 = vmatpush1.bf16.msra.mxu1 %v1953_v31  ;;  %1209 = vmatpush1.bf16.msra.mxu0 %v2150_v32  ;;  %v2186_v31 = vld [vmem:[%s3024_s2 + $0x130] ss:$8 sps:$4 sm:$0xff]   ;;  %v2191_v32 = vld [vmem:[%s3024_s2 + $0x144] ss:$8 sps:$4 sm:$0xff]  }
 0x149   :  { %v640_v54 = vmax.f32 %v573_v40, 0.0  ;;  %v577_v55 = vadd.f32 %v576_v52, %v2516_v47  ;;  %1210 = vmatprep.subr.bf16.mxu0 %v2155_v35  ;;  %v2192_v35 = vld [vmem:[%s3024_s2 + $0x150] ss:$8 sps:$4 sm:$0xff]   ;;  %v2197_v36 = vld [vmem:[%s3024_s2 + $0x164] ss:$8 sps:$4 sm:$0xff]  }
 0x14a   :  { %v643_v56 = vmax.f32 %v575_v51, 0.0  ;;  %v2195_v39 = vld [vmem:[%s3024_s2 + $0x160] ss:$8 sps:$4 sm:$0xff]   ;;  %v2200_v40 = vld [vmem:[%s3024_s2 + $0x174] ss:$8 sps:$4 sm:$0xff]  }
 0x14b   :  { %v644_v57 = vmax.f32 %v577_v55, 0.0  ;;  %v2198_v49 = vld [vmem:[%s3024_s2 + $0x170] ss:$8 sps:$4 sm:$0xff]   ;;  %v2201_v51 = vld [vmem:[%s3024_s2 + $0x180] ss:$8 sps:$4 sm:$0xff]  }
 0x14c   :  { %v1957_v58 = vpack.c.bf16 %v643_v56, %v639_v50  ;;  %1211 = vmatpush1.bf16.msra.mxu0 %v2153_v53  ;;  %v2203_v50 = vld [vmem:[%s3024_s2 + $0x184] ss:$8 sps:$4 sm:$0xff]   ;;  %v2206_v52 = vld [vmem:[%s3024_s2 + $0x194] ss:$8 sps:$4 sm:$0xff]   ;;  %v2204_v53 = vld [vmem:[%s3024_s2 + $0x190] ss:$8 sps:$4 sm:$0xff]  }
 0x14d   :  { %v1955_v60 = vpack.c.bf16 %v644_v57, %v640_v54  ;;  %v580_v61 = vpop.f32.mrb[44].mxu1  ;;  %1212 = vmatprep.subr.bf16.mxu0 %v2158_v48  ;;  %v2209_v54 = vld [vmem:[%s3024_s2 + $0x1a4] ss:$8 sps:$4 sm:$0xff]   ;;  %v2207_v55 = vld [vmem:[%s3024_s2 + $0x1a0] ss:$8 sps:$4 sm:$0xff]  }
 0x14e   :  { %v581_v63 = vadd.f32 %v580_v61, %v2513_v37  ;;  %v582_v0 = vpop.f32.mrb[45].mxu1  ;;  %v2212_v48 = vld [vmem:[%s3024_s2 + $0x1b4] ss:$8 sps:$4 sm:$0xff]   ;;  %v2210_v56 = vld [vmem:[%s3024_s2 + $0x1b0] ss:$8 sps:$4 sm:$0xff]  }
 0x14f   :  { %v583_v1 = vadd.f32 %v582_v0, %v2516_v47  ;;  %v584_v2 = vpop.f32.mrb[46].mxu1  ;;  %1956 = vmatprep.subr.bf16.mxu1 %v1955_v60  ;;  %v2215_v57 = vld [vmem:[%s3024_s2 + $0x1c4] ss:$8 sps:$4 sm:$0xff]   ;;  %v2213_v60 = vld [vmem:[%s3024_s2 + $0x1c0] ss:$8 sps:$4 sm:$0xff]  }
 0x150   :  { %v647_v3 = vmax.f32 %v581_v63, 0.0  ;;  %v585_v4 = vadd.f32 %v584_v2, %v2513_v37  ;;  %v586_v5 = vpop.f32.mrb[47].mxu1  ;;  %1958 = vmatpush1.bf16.msra.mxu1 %v1957_v58  ;;  %1213 = vmatpush1.bf16.msra.mxu0 %v2156_v59  ;;  %v2162_v37 = vld [vmem:[%s3024_s2 + $0xb0] ss:$8 sps:$4 sm:$0xff]   ;;  %v2221_v0 = vld [vmem:[%s3024_s2 + $0x1e4] ss:$8 sps:$4 sm:$0xff]  }
 0x151   :  { %v648_v7 = vmax.f32 %v583_v1, 0.0  ;;  %v587_v13 = vadd.f32 %v586_v5, %v2516_v47  ;;  %1214 = vmatprep.subr.bf16.mxu0 %v2161_v62  ;;  %v2165_v47 = vld [vmem:[%s3024_s2 + $0xc0] ss:$8 sps:$4 sm:$0xff]   ;;  %v2218_v62 = vld [vmem:[%s3024_s2 + $0x1d4] ss:$8 sps:$4 sm:$0xff]  }
 0x152   :  { %v651_v11 = vmax.f32 %v585_v4, 0.0  ;;  %v2216_v63 = vld [vmem:[%s3024_s2 + $0x1d0] ss:$8 sps:$4 sm:$0xff]   ;;  %v2219_v1 = vld [vmem:[%s3024_s2 + $0x1e0] ss:$8 sps:$4 sm:$0xff]  }
 0x153   :  { %v652_v10 = vmax.f32 %v587_v13, 0.0  ;;  %v2224_v2 = vld [vmem:[%s3024_s2 + $0x1f4] ss:$8 sps:$4 sm:$0xff]   ;;  %v43_v5 = vld [vmem:[%s3025_s3 + $0x80] sm:$0xff] }
 0x154   :  { %v1961_v42 = vpack.c.bf16 %v651_v11, %v647_v3  ;;  %1215 = vmatpush1.bf16.msra.mxu0 %v2159_v6  ;;  %v2222_v3 = vld [vmem:[%s3024_s2 + $0x1f0] ss:$8 sps:$4 sm:$0xff]   ;;  %v44_v6 = vld [vmem:[%s3025_s3 + $0x88] sm:$0xff]  ;;  %v27_v13 = vld [vmem:[%s3025_s3] sm:$0xff] }
 0x155   :  { %v1959_v12 = vpack.c.bf16 %v652_v10, %v648_v7  ;;  %1216 = vmatprep.subr.bf16.mxu0 %v2164_v8  ;;  %v1963_v7 = vpack.c.bf16 %v44_v6, %v43_v5  ;;  %v28_v8 = vld [vmem:[%s3025_s3 + $0x8] sm:$0xff]  ;;  %v45_v10 = vld [vmem:[%s3025_s3 + $0x90] sm:$0xff] }
 0x156   :  { %v1965_v11 = vpack.c.bf16 %v28_v8, %v27_v13 }
 0x157   :  { %1960 = vmatprep.subr.bf16.mxu1 %v1959_v12  ;;  %v29_v12 = vld [vmem:[%s3025_s3 + $0x10] sm:$0xff] }
 0x158   :  { %1962 = vmatpush1.bf16.msra.mxu1 %v1961_v42  ;;  %1217 = vmatpush1.bf16.msra.mxu0 %v2162_v37  ;;  %v46_v42 = vld [vmem:[%s3025_s3 + $0x98] sm:$0xff] }
 0x159   :  { %1218 = vmatprep.subr.bf16.mxu0 %v2167_v15  ;;  %1964 = vmatprep.subr.bf16.mxu1 %v1963_v7  ;;  %v1967_v37 = vpack.c.bf16 %v46_v42, %v45_v10  ;;  %v30_v15 = vld [vmem:[%s3025_s3 + $0x18] sm:$0xff] }
 0x15b   :  { %792 = vmatmul.mubr.f32.vlgmr.msra.gmra.mrb[48].mxu1 %v654_v21  ;;  %v2176_v21 = vld [vmem:[%s3024_s2 + $0xf4] ss:$8 sps:$4 sm:$0xff]  }
 0x15c   :  { %1219 = vmatpush1.bf16.msra.mxu0 %v2165_v47  ;;  %1966 = vmatpush3.bf16.msra.mxu1 %v1965_v11  ;;  %v1969_v47 = vpack.c.bf16 %v30_v15, %v29_v12 }
 0x15d   :  { %1220 = vmatprep.subr.bf16.mxu0 %v2170_v16  ;;  %1968 = vmatprep.subr.bf16.mxu1 %v1967_v37  ;;  %v47_v16 = vld [vmem:[%s3025_s3 + $0xa0] sm:$0xff] }
 0x160   :  { %1221 = vmatpush1.bf16.msra.mxu0 %v2168_v38  ;;  %1970 = vmatpush3.bf16.msra.mxu1 %v1969_v47  ;;  %v48_v38 = vld [vmem:[%s3025_s3 + $0xa8] sm:$0xff] }
 0x161   :  { %1222 = vmatprep.subr.bf16.mxu0 %v2173_v18  ;;  %v1971_v18 = vpack.c.bf16 %v48_v38, %v47_v16 }
 0x163   :  { %1972 = vmatprep.subr.bf16.mxu1 %v1971_v18 }
 0x164   :  { %1223 = vmatpush1.bf16.msra.mxu0 %v2171_v14  ;;  %v31_v14 = vld [vmem:[%s3025_s3 + $0x20] sm:$0xff] }
 0x165   :  { %1224 = vmatprep.subr.bf16.mxu0 %v2176_v21  ;;  %v32_v21 = vld [vmem:[%s3025_s3 + $0x28] sm:$0xff] }
 0x168   :  { %1225 = vmatpush1.bf16.msra.mxu0 %v2174_v19  ;;  %v1973_v19 = vpack.c.bf16 %v32_v21, %v31_v14 }
 0x169   :  { %1235 = vmatprep.subr.bf16.mxu0 %v2179_v20  ;;  %v49_v20 = vld [vmem:[%s3025_s3 + $0xb0] sm:$0xff] }
 0x16a   :  { %1974 = vmatpush3.bf16.msra.mxu1 %v1973_v19 }
 0x1fe   :  { %v722_v9 = vpop.f32.mrb[16].mxu0 }
 0x1ff   :  { %v724_v22 = vpop.f32.mrb[17].mxu0  ;;  %v798_v25 = vpack.c.bf16 %v722_v9, %v722_v9  ;;  %v50_v9 = vld [vmem:[%s3025_s3 + $0xb8] sm:$0xff] }
 0x200   :  { %v799_v23 = vpack.c.bf16 %v724_v22, %v724_v22  ;;  %v1975_v22 = vpack.c.bf16 %v50_v9, %v49_v20 }
 0x202   :  { %1226 = vmatprep.mubr.bf16.mxu0 %v799_v23  ;;  %v33_v23 = vld [vmem:[%s3025_s3 + $0x30] sm:$0xff]  ;;  %1976 = vmatprep.subr.bf16.mxu1 %v1975_v22 }
 0x203   :  { %1227 = vmatmul.mubr.bf16.vlgmr.msra.gmra.mrb[20].mxu0 %v798_v25 }
 0x204   :  { %1236 = vmatpush1.bf16.msra.mxu0 %v2177_v24  ;;  %v34_v24 = vld [vmem:[%s3025_s3 + $0x38] sm:$0xff] }
 0x205   :  { %1237 = vmatprep.subr.bf16.mxu0 %v2182_v26  ;;  %v1977_v25 = vpack.c.bf16 %v34_v24, %v33_v23  ;;  %v51_v26 = vld [vmem:[%s3025_s3 + $0xc0] sm:$0xff] }
 0x207   :  { %1978 = vmatpush3.bf16.msra.mxu1 %v1977_v25 }
 0x208   :  { %1238 = vmatpush1.bf16.msra.mxu0 %v2180_v27  ;;  %v52_v27 = vld [vmem:[%s3025_s3 + $0xc8] sm:$0xff] }
 0x209   :  { %1239 = vmatprep.subr.bf16.mxu0 %v2185_v28  ;;  %v1979_v28 = vpack.c.bf16 %v52_v27, %v51_v26 }
 0x20b   :  { %1980 = vmatprep.subr.bf16.mxu1 %v1979_v28 }
 0x20c   :  { %1240 = vmatpush1.bf16.msra.mxu0 %v2183_v29  ;;  %v35_v29 = vld [vmem:[%s3025_s3 + $0x40] sm:$0xff] }
 0x20d   :  { %1241 = vmatprep.subr.bf16.mxu0 %v2188_v30  ;;  %v36_v30 = vld [vmem:[%s3025_s3 + $0x48] sm:$0xff] }
 0x210   :  { %1242 = vmatpush1.bf16.msra.mxu0 %v2186_v31  ;;  %v1981_v31 = vpack.c.bf16 %v36_v30, %v35_v29 }
 0x211   :  { %1243 = vmatprep.subr.bf16.mxu0 %v2191_v32  ;;  %v53_v32 = vld [vmem:[%s3025_s3 + $0xd0] sm:$0xff] }
 0x212   :  { %1982 = vmatpush3.bf16.msra.mxu1 %v1981_v31 }
 0x214   :  { %1244 = vmatpush1.bf16.msra.mxu0 %v2189_v33  ;;  %v54_v33 = vld [vmem:[%s3025_s3 + $0xd8] sm:$0xff] }
 0x215   :  { %1245 = vmatprep.subr.bf16.mxu0 %v2194_v34  ;;  %v1983_v34 = vpack.c.bf16 %v54_v33, %v53_v32 }
 0x217   :  { %1984 = vmatprep.subr.bf16.mxu1 %v1983_v34 }
 0x218   :  { %1246 = vmatpush1.bf16.msra.mxu0 %v2192_v35  ;;  %v37_v35 = vld [vmem:[%s3025_s3 + $0x50] sm:$0xff] }
 0x219   :  { %1247 = vmatprep.subr.bf16.mxu0 %v2197_v36  ;;  %v38_v36 = vld [vmem:[%s3025_s3 + $0x58] sm:$0xff] }
 0x21c   :  { %1248 = vmatpush1.bf16.msra.mxu0 %v2195_v39  ;;  %v1985_v39 = vpack.c.bf16 %v38_v36, %v37_v35 }
 0x21d   :  { %1249 = vmatprep.subr.bf16.mxu0 %v2200_v40  ;;  %v55_v40 = vld [vmem:[%s3025_s3 + $0xe0] sm:$0xff] }
 0x21e   :  { %1986 = vmatpush3.bf16.msra.mxu1 %v1985_v39 }
 0x220   :  { %1250 = vmatpush1.bf16.msra.mxu0 %v2198_v49  ;;  %v56_v49 = vld [vmem:[%s3025_s3 + $0xe8] sm:$0xff] }
 0x221   :  { %1251 = vmatprep.subr.bf16.mxu0 %v2203_v50  ;;  %v1987_v50 = vpack.c.bf16 %v56_v49, %v55_v40  ;;  %v1322_v40 = vsub.s32 2, %v2439_v43  ;;  %v1332_v49 = vsub.s32 3, %v2439_v43 }
 0x223   :  { %1988 = vmatprep.subr.bf16.mxu1 %v1987_v50  ;;  %v2867_v50 = vld [vmem:[%s3026_s4] sm:$0xff] }
 0x224   :  { %1252 = vmatpush1.bf16.msra.mxu0 %v2201_v51  ;;  %v39_v51 = vld [vmem:[%s3025_s3 + $0x60] sm:$0xff] }
 0x225   :  { %1253 = vmatprep.subr.bf16.mxu0 %v2206_v52  ;;  %v40_v52 = vld [vmem:[%s3025_s3 + $0x68] sm:$0xff] }
 0x228   :  { %1254 = vmatpush1.bf16.msra.mxu0 %v2204_v53  ;;  %v1989_v53 = vpack.c.bf16 %v40_v52, %v39_v51  ;;  %v1323_v51 = vrot.slane %v2867_v50, %v1322_v40 }
 0x229   :  { %1255 = vmatprep.subr.bf16.mxu0 %v2209_v54  ;;  %v57_v54 = vld [vmem:[%s3025_s3 + $0xf0] sm:$0xff] }
 0x22a   :  { %1990 = vmatpush3.bf16.msra.mxu1 %v1989_v53  ;;  %v2236_v53 = vld [vmem:[%s3026_s4 + $0x8] sm:$0xff] }
 0x22c   :  { %1256 = vmatpush1.bf16.msra.mxu0 %v2207_v55  ;;  %v58_v55 = vld [vmem:[%s3025_s3 + $0xf8] sm:$0xff] }
 0x22d   :  { %1257 = vmatprep.subr.bf16.mxu0 %v2212_v48  ;;  %v41_v48 = vld [vmem:[%s3025_s3 + $0x70] sm:$0xff] }
 0x22e   :  { %v793_v58 = vpop.f32.mrb[48].mxu1 }
 0x22f   :  { %v795_v59 = vpop.f32.mrb[49].mxu1  ;;  %v800_v4 = vpack.c.bf16 %v793_v58, %v793_v58 }
 0x230   :  { %1258 = vmatpush1.bf16.msra.mxu0 %v2210_v56  ;;  %v801_v61 = vpack.c.bf16 %v795_v59, %v795_v59  ;;  %v1991_v56 = vpack.c.bf16 %v58_v55, %v57_v54  ;;  %v2263_v59 = vmov 0.0|0.0   ;;  %v1327_v54 = vrot.slane %v2236_v53, %v1322_v40  ;;  %v81_v40 = vld [vmem:[%s3025_s3 + $0x1b0] sm:$0xff] }
 0x231   :  { %1259 = vmatprep.subr.bf16.mxu0 %v2215_v57  ;;  %v42_v57 = vld [vmem:[%s3025_s3 + $0x78] sm:$0xff] }
 0x232   :  { %1267 = vmatprep.mubr.bf16.mxu0 %v801_v61  ;;  %v1993_v58 = vpack.c.bf16 %v42_v57, %v41_v48  ;;  %1992 = vmatprep.subr.bf16.mxu1 %v1991_v56  ;;  %v1333_v56 = vrot.slane %v2867_v50, %v1332_v49 }
 0x234   :  { %1260 = vmatpush1.bf16.msra.mxu0 %v2213_v60  ;;  %1994 = vmatpush3.bf16.msra.mxu1 %v1993_v58  ;;  %v868_v60 = vsub.s32 1, %v2439_v43  ;;  %v1337_v58 = vrot.slane %v2236_v53, %v1332_v49  ;;  %v82_v49 = vld [vmem:[%s3025_s3 + $0x1b8] sm:$0xff]  ;;  %v84_v53 = vld [vmem:[%s3025_s3 + $0x1c8] sm:$0xff] }
 0x235   :  { %1261 = vmatprep.subr.bf16.mxu0 %v2218_v62  ;;  %1995 = vmatprep.subr.bf16.mxu1 %v2263_v59 }
 0x236   :  { %v869_v61 = vrot.slane %v2447_v45, %v868_v60  ;;  %v873_v62 = vrot.slane %v2452_v46, %v868_v60 }
 0x238   :  { %1262 = vmatpush1.bf16.msra.mxu0 %v2216_v63 }
 0x239   :  { %1263 = vmatprep.subr.bf16.mxu0 %v2221_v0 }
 0x23c   :  { %1264 = vmatpush1.bf16.msra.mxu0 %v2219_v1 }
 0x23d   :  { %1265 = vmatprep.subr.bf16.mxu0 %v2224_v2 }
 0x240   :  { %1266 = vmatpush1.bf16.msra.mxu0 %v2222_v3 }
 0x243   :  { %1268 = vmatmul.mubr.bf16.vlgmr.msra.gmra.mrb[20].mxu0 %v800_v4 }
 0x316   :  { %v1269_v63 = vpop.f32.mrb[20].mxu0 }
 0x317   :  { %v2059_v0 = vadd.f32 %v1269_v63, %v869_v61  ;;  %v1271_v1 = vpop.f32.mrb[21].mxu0  ;;  %v59_v63 = vld [vmem:[%s3025_s3 + $0x100] sm:$0xff] }
 0x318   :  { %v2060_v2 = vadd.f32 %v1271_v1, %v873_v62  ;;  %v1273_v3 = vpop.f32.mrb[22].mxu0 }
 0x319   :  { %v1277_v4 = vsel %vm1276_vm0, %v2059_v0, 0.0  ;;  %v1274_v5 = vpop.f32.mrb[23].mxu0 }
 0x31a   :  { %v1278_v6 = vrot.slane %v1277_v4, 4  ;;  %v1284_v7 = vsel %vm1276_vm0, %v2060_v2, 0.0  ;;  %v61_v5 = vld [vmem:[%s3025_s3 + $0x110] sm:$0xff] }
 0x31b   :  { %v1285_v13 = vrot.slane %v1284_v7, 4 }
 0x31c   :  { %v1279_v8 = vadd.f32 %v1278_v6, %v1277_v4  ;;  %v62_v6 = vld [vmem:[%s3025_s3 + $0x118] sm:$0xff] }
 0x31d   :  { %v1286_v11 = vadd.f32 %v1285_v13, %v1284_v7  ;;  %v1999_v7 = vpack.c.bf16 %v62_v6, %v61_v5  ;;  %v63_v13 = vld [vmem:[%s3025_s3 + $0x120] sm:$0xff] }
 0x31e   :  { %v1280_v10 = vrot.slane %v1279_v8, 2 }
 0x31f   :  { %v1287_v42 = vrot.slane %v1286_v11, 2 }
 0x320   :  { %v1281_v45 = vadd.f32 %v1280_v10, %v1279_v8  ;;  %v64_v8 = vld [vmem:[%s3025_s3 + $0x128] sm:$0xff]  ;;  %v65_v10 = vld [vmem:[%s3025_s3 + $0x130] sm:$0xff] }
 0x321   :  { %v1288_v37 = vadd.f32 %v1287_v42, %v1286_v11  ;;  %v2002_v11 = vpack.c.bf16 %v64_v8, %v63_v13  ;;  %v66_v42 = vld [vmem:[%s3025_s3 + $0x138] sm:$0xff] }
 0x322   :  { %v1282_v46 = vrot.slane %v1281_v45, 1 }
 0x323   :  { %v1289_v12 = vrot.slane %v1288_v37, 1 }
 0x324   :  { %v1283_v15 = vadd.f32 %v1282_v46, %v1281_v45  ;;  %v2005_v45 = vpack.c.bf16 %v66_v42, %v65_v10  ;;  %v68_v46 = vld [vmem:[%s3025_s3 + $0x148] sm:$0xff] }
 0x325   :  { %v1290_v47 = vadd.f32 %v1289_v12, %v1288_v37  ;;  %v67_v37 = vld [vmem:[%s3025_s3 + $0x140] sm:$0xff] }
 0x326   :  { %v1292_v16 = vmul.f32 0.5, %v1283_v15  ;;  %v2008_v12 = vpack.c.bf16 %v68_v46, %v67_v37  ;;  %v69_v15 = vld [vmem:[%s3025_s3 + $0x150] sm:$0xff] }
 0x327   :  { %v1293_v38 = vmul.f32 0.5, %v1290_v47  ;;  %v70_v47 = vld [vmem:[%s3025_s3 + $0x158] sm:$0xff] }
 0x328   :  { %v1294_v18 = vsub.f32 %v2059_v0, %v1292_v16  ;;  %v60_v0 = vld [vmem:[%s3025_s3 + $0x108] sm:$0xff]  ;;  %v2011_v16 = vpack.c.bf16 %v70_v47, %v69_v15 }
 0x329   :  { %v1295_v14 = vsub.f32 %v2060_v2, %v1293_v38  ;;  %v1996_v3 = vpack.c.bf16 %v60_v0, %v59_v63  ;;  %v71_v38 = vld [vmem:[%s3025_s3 + $0x160] sm:$0xff]  ;;  %v1418_v0 = vsub.s32 5, %v2439_v43 }
 0x32a   :  { %v1296_v21 = vmul.f32 %v1294_v18, %v1294_v18 }
 0x32b   :  { %v1297_v19 = vmul.f32 %v1295_v14, %v1295_v14 }
 0x32c   :  { %v1298_v20 = vsel %vm1276_vm0, %v1296_v21, 0.0  ;;  %v73_v21 = vld [vmem:[%s3025_s3 + $0x170] sm:$0xff] }
 0x32d   :  { %v1299_v9 = vrot.slane %v1298_v20, 4  ;;  %v1305_v22 = vsel %vm1276_vm0, %v1297_v19, 0.0  ;;  %v74_v19 = vld [vmem:[%s3025_s3 + $0x178] sm:$0xff] }
 0x32e   :  { %v1306_v23 = vrot.slane %v1305_v22, 4 }
 0x32f   :  { %v1300_v24 = vadd.f32 %v1299_v9, %v1298_v20  ;;  %v2017_v20 = vpack.c.bf16 %v74_v19, %v73_v21  ;;  %v1344_v9 = vsub.s32 4, %v2439_v43  ;;  %v1513_v21 = vsub.s32 6, %v2439_v43 }
 0x330   :  { %v1307_v25 = vadd.f32 %v1306_v23, %v1305_v22  ;;  %v1518_v19 = vsub.s32 7, %v2439_v43 }
 0x331   :  { %v1301_v26 = vrot.slane %v1300_v24, 2  ;;  %v1345_v23 = vrot.slane %v2867_v50, %v1344_v9 }
 0x332   :  { %v1308_v27 = vrot.slane %v1307_v25, 2 }
 0x333   :  { %v1302_v28 = vadd.f32 %v1301_v26, %v1300_v24 }
 0x334   :  { %v1309_v29 = vadd.f32 %v1308_v27, %v1307_v25 }
 0x335   :  { %v1303_v30 = vrot.slane %v1302_v28, 1 }
 0x336   :  { %v1310_v31 = vrot.slane %v1309_v29, 1 }
 0x337   :  { %v1304_v32 = vadd.f32 %v1303_v30, %v1302_v28  ;;  %v75_v28 = vld [vmem:[%s3025_s3 + $0x180] sm:$0xff] }
 0x338   :  { %v1311_v33 = vadd.f32 %v1310_v31, %v1309_v29  ;;  %v76_v29 = vld [vmem:[%s3025_s3 + $0x188] sm:$0xff]  ;;  %v77_v31 = vld [vmem:[%s3025_s3 + $0x190] sm:$0xff] }
 0x339   :  { %v1312_v34 = vmul.f32 0.5, %v1304_v32  ;;  %v2020_v30 = vpack.c.bf16 %v76_v29, %v75_v28  ;;  %v1525_v28 = vrot.slane %v2535_v17, %v2442_v44 }
 0x33a   :  { %v1313_v35 = vmul.f32 0.5, %v1311_v33  ;;  %v79_v33 = vld [vmem:[%s3025_s3 + $0x1a0] sm:$0xff] }
 0x33b   :  { %v1314_v36 = vadd.f32 1e-05, %v1312_v34  ;;  %v80_v34 = vld [vmem:[%s3025_s3 + $0x1a8] sm:$0xff] }
 0x33c   :  { %v1315_v39 = vadd.f32 1e-05, %v1313_v35 }
 0x33d   :  { %2225 = vrsqrt.f32 %v1314_v36  ;;  %v2026_v36 = vpack.c.bf16 %v80_v34, %v79_v33 }
 0x33e   :  { %2227 = vrsqrt.f32 %v1315_v39 }
 0x347   :  { %v2226_v52 = vpop.eup %2225 }
 0x348   :  { %v2228_v55 = vpop.eup %2227  ;;  %v1318_v48 = vmul.f32 %v2226_v52, %v1294_v18  ;;  %v72_v18 = vld [vmem:[%s3025_s3 + $0x168] sm:$0xff]  ;;  %v83_v52 = vld [vmem:[%s3025_s3 + $0x1c0] sm:$0xff] }
 0x349   :  { %v1319_v57 = vmul.f32 %v2228_v55, %v1295_v14  ;;  %v2014_v14 = vpack.c.bf16 %v72_v18, %v71_v38  ;;  %v85_v55 = vld [vmem:[%s3025_s3 + $0x1d0] sm:$0xff] }
 0x34a   :  { %v1328_v60 = vmul.f32 %v1323_v51, %v1318_v48  ;;  %v2029_v51 = vpack.c.bf16 %v82_v49, %v81_v40  ;;  %v86_v48 = vld [vmem:[%s3025_s3 + $0x1d8] sm:$0xff] }
 0x34b   :  { %v1329_v61 = vmul.f32 %v1327_v54, %v1319_v57  ;;  %v2032_v54 = vpack.c.bf16 %v84_v53, %v83_v52  ;;  %v87_v57 = vld [vmem:[%s3025_s3 + $0x1e0] sm:$0xff] }
 0x34c   :  { %v1338_v62 = vadd.f32 %v1333_v56, %v1328_v60  ;;  %v2035_v56 = vpack.c.bf16 %v86_v48, %v85_v55 }
 0x34d   :  { %v1339_v1 = vadd.f32 %v1337_v58, %v1329_v61  ;;  %v88_v58 = vld [vmem:[%s3025_s3 + $0x1e8] sm:$0xff]  ;;  %v89_v61 = vld [vmem:[%s3025_s3 + $0x1f0] sm:$0xff] }
 0x34e   :  { %v1340_v4 = vmax.f32 %v1338_v62, 0.0  ;;  %v2038_v60 = vpack.c.bf16 %v88_v58, %v87_v57  ;;  %v90_v62 = vld [vmem:[%s3025_s3 + $0x1f8] sm:$0xff] }
 0x34f   :  { %v1341_v2 = vmax.f32 %v1339_v1, 0.0  ;;  %v2041_v63 = vpack.c.bf16 %v90_v62, %v89_v61  ;;  %v1419_v1 = vrot.slane %v2867_v50, %v1418_v0 }
 0x351   :  { %1410 = vmatprep.mubr.f32.mxu1 %v1341_v2 }
 0x352   :  { %1411 = vmatmul.mubr.f32.vlgmr.msra.gmra.mrb[50].mxu1 %v1340_v4 }
 0x353   :  { %1997 = vmatpush3.bf16.msra.mxu1 %v1996_v3  ;;  %1861 = vmatprep.mubr.msk.f32.mxu1 %vm2264_vm1, %v2262_v41 }
 0x354   :  { %1998 = vmatprep.subr.bf16.mxu1 %v2263_v59 }
 0x357   :  { %2000 = vmatpush3.bf16.msra.mxu1 %v1999_v7 }
 0x358   :  { %2001 = vmatprep.subr.bf16.mxu1 %v2263_v59 }
 0x35b   :  { %2003 = vmatpush3.bf16.msra.mxu1 %v2002_v11 }
 0x35c   :  { %2004 = vmatprep.subr.bf16.mxu1 %v2263_v59 }
 0x35f   :  { %2006 = vmatpush3.bf16.msra.mxu1 %v2005_v45 }
 0x360   :  { %2007 = vmatprep.subr.bf16.mxu1 %v2263_v59 }
 0x363   :  { %2009 = vmatpush3.bf16.msra.mxu1 %v2008_v12 }
 0x364   :  { %2010 = vmatprep.subr.bf16.mxu1 %v2263_v59 }
 0x367   :  { %2012 = vmatpush3.bf16.msra.mxu1 %v2011_v16 }
 0x368   :  { %2013 = vmatprep.subr.bf16.mxu1 %v2263_v59 }
 0x36b   :  { %2015 = vmatpush3.bf16.msra.mxu1 %v2014_v14 }
 0x36c   :  { %2016 = vmatprep.subr.bf16.mxu1 %v2263_v59 }
 0x36f   :  { %2018 = vmatpush3.bf16.msra.mxu1 %v2017_v20  ;;  %v1514_v20 = vrot.slane %v2867_v50, %v1513_v21 }
 0x370   :  { %2019 = vmatprep.subr.bf16.mxu1 %v2263_v59 }
 0x425   :  { %v1792_v22 = vpop.f32.mrb[50].mxu1 }
 0x426   :  { %v1793_v24 = vpop.f32.mrb[51].mxu1 }
 0x427   :  { %v1794_v25 = vadd.f32 %v1793_v24, %v1792_v22 }
 0x429   :  { %v2933_v26 = vadd.f32 %v1794_v25, %v1345_v23  ;;  %v1519_v23 = vrot.slane %v2867_v50, %v1518_v19 }
 0x42b   :  { %1862 = vmatmul.mubr.f32.vlgmr.msra.gmra.mrb[52].mxu1 %v2933_v26  ;;  %v1604_v27 = vmul.f32 %v2933_v26, %v2933_v26 }
 0x42c   :  { %1896 = vmatprep.mubr.msk.f32.mxu1 %vm2264_vm1, %v2262_v41  ;;  %2021 = vmatpush3.bf16.msra.mxu1 %v2020_v30  ;;  %v78_v41 = vld [vmem:[%s3025_s3 + $0x198] sm:$0xff] }
 0x42d   :  { %1606 = vrot.lane.b32.xlu0 %v1604_v27, %s2265_s13  ;;  %2022 = vmatprep.subr.bf16.mxu1 %v2263_v59  ;;  %v2023_v32 = vpack.c.bf16 %v78_v41, %v77_v31 }
 0x430   :  { %2024 = vmatpush3.bf16.msra.mxu1 %v2023_v32 }
 0x431   :  { %2025 = vmatprep.subr.bf16.mxu1 %v2263_v59 }
 0x434   :  { %2027 = vmatpush3.bf16.msra.mxu1 %v2026_v36 }
 0x435   :  { %2028 = vmatprep.subr.bf16.mxu1 %v2263_v59 }
 0x438   :  { %2030 = vmatpush3.bf16.msra.mxu1 %v2029_v51 }
 0x439   :  { %2031 = vmatprep.subr.bf16.mxu1 %v2263_v59 }
 0x43c   :  { %2033 = vmatpush3.bf16.msra.mxu1 %v2032_v54 }
 0x43d   :  { %2034 = vmatprep.subr.bf16.mxu1 %v2263_v59 }
 0x440   :  { %2036 = vmatpush3.bf16.msra.mxu1 %v2035_v56 }
 0x441   :  { %2037 = vmatprep.subr.bf16.mxu1 %v2263_v59 }
 0x444   :  { %2039 = vmatpush3.bf16.msra.mxu1 %v2038_v60 }
 0x445   :  { %2040 = vmatprep.subr.bf16.mxu1 %v2263_v59 }
 0x448   :  { %2042 = vmatpush3.bf16.msra.mxu1 %v2041_v63 }
 0x49f   :  { %v1607_v35 = vpop.permute.xlu0 %1606 }
 0x4a0   :  { %v1609_v39 = vsel %vm1597_vm2, %v1607_v35, 0.0 }
 0x4a1   :  { %1610 = vadd.xlane.f32.xlu0 %v1609_v39 }
 0x4fe   :  { %v1486_v2 = vpop.f32.mrb[52].mxu1 }
 0x4ff   :  { %v1487_v3 = vadd.f32 %v1486_v2, %v1419_v1  ;;  %v1863_v4 = vpop.f32.mrb[53].mxu1 }
 0x501   :  { %v1490_v5 = vsel %vm1276_vm0, %v1487_v3, 0.0 }
 0x502   :  { %v1491_v59 = vrot.slane %v1490_v5, 4 }
 0x504   :  { %v1492_v6 = vadd.f32 %v1491_v59, %v1490_v5 }
 0x506   :  { %v1493_v7 = vrot.slane %v1492_v6, 2 }
 0x508   :  { %v1494_v13 = vadd.f32 %v1493_v7, %v1492_v6 }
 0x50a   :  { %v1495_v8 = vrot.slane %v1494_v13, 1 }
 0x50c   :  { %v1496_v11 = vadd.f32 %v1495_v8, %v1494_v13 }
 0x50e   :  { %v1497_v10 = vmul.f32 0.5, %v1496_v11 }
 0x510   :  { %v1498_v42 = vsub.f32 %v1487_v3, %v1497_v10 }
 0x512   :  { %v1499_v45 = vmul.f32 %v1498_v42, %v1498_v42 }
 0x514   :  { %v1500_v37 = vsel %vm1276_vm0, %v1499_v45, 0.0 }
 0x515   :  { %v1501_v46 = vrot.slane %v1500_v37, 4 }
 0x517   :  { %v1502_v12 = vadd.f32 %v1501_v46, %v1500_v37 }
 0x519   :  { %v1503_v15 = vrot.slane %v1502_v12, 2 }
 0x51b   :  { %v1504_v47 = vadd.f32 %v1503_v15, %v1502_v12 }
 0x51d   :  { %v1505_v16 = vrot.slane %v1504_v47, 1 }
 0x51f   :  { %v1506_v38 = vadd.f32 %v1505_v16, %v1504_v47 }
 0x521   :  { %v1507_v18 = vmul.f32 0.5, %v1506_v38 }
 0x523   :  { %v1508_v14 = vadd.f32 1e-05, %v1507_v18 }
 0x525   :  { %2229 = vrsqrt.f32 %v1508_v14 }
 0x52e   :  { %v1611_v30 = vpop.xlane.xlu0 %1610 }
 0x52f   :  { %v2230_v9 = vpop.eup %2229  ;;  %v1612_v33 = vmax.f32 %v1611_v30, 1e-24 }
 0x530   :  { %v1510_v22 = vmul.f32 %v2230_v9, %v1498_v42 }
 0x531   :  { %2231 = vrsqrt.f32 %v1612_v33 }
 0x532   :  { %v1515_v24 = vmul.f32 %v1514_v20, %v1510_v22 }
 0x534   :  { %v1520_v25 = vadd.f32 %v1519_v23, %v1515_v24 }
 0x536   :  { %v1521_v27 = vmax.f32 %v1520_v25, 0.0 }
 0x538   :  { %1897 = vmatmul.mubr.f32.vlgmr.msra.gmra.mrb[54].mxu1 %v1521_v27 }
 0x53b   :  { %v2232_v34 = vpop.eup %2231 }
 0x53c   :  { %v1614_v50 = vmul.f32 %v2232_v34, %v2933_v26 }
 0x60b   :  { %v1592_v29 = vpop.f32.mrb[54].mxu1 }
 0x60c   :  { %v1593_v31 = vadd.f32 %v1592_v29, %v1525_v28  ;;  %v1898_v41 = vpop.f32.mrb[55].mxu1 }
 0x60e   :  { %v1596_v32 = vmul.f32 %v1593_v31, %v1593_v31 }
 0x610   :  { %v1598_v43 = vsel %vm1597_vm2, %v1596_v32, 0.0 }
 0x611   :  { %1599 = vadd.xlane.f32.xlu1 %v1598_v43 }
 0x622   :  { %1616 = vrot.lane.b32.xlu1 %v1614_v50, %s2265_s13 }
 0x69e   :  { %v1600_v35 = vpop.xlane.xlu1 %1599 }
 0x69f   :  { %v1601_v36 = vmax.f32 %v1600_v35, 1e-24 }
 0x6a1   :  { %2233 = vrsqrt.f32 %v1601_v36 }
 0x6a2   :  { %v1617_v17 = vpop.permute.xlu1 %1616 }
 0x6ab   :  { %v2234_v39 = vpop.eup %2233 }
 0x6ac   :  { %v1603_v44 = vmul.f32 %v2234_v39, %v1593_v31 }
 0x6ae   :  { %v1619_v40 = vmul.f32 %v1617_v17, %v1603_v44 }
 0x6b0   :  { %v1620_v49 = vsel %vm1597_vm2, %v1619_v40, 0.0 }
 0x6b1   :  { %1621 = vadd.xlane.f32.xlu1 %v1620_v49 }
 0x73e   :  { %v1622_v51 = vpop.xlane.xlu1 %1621 }
 0x73f   :  { %v1623_v52 = vmul.f32 2.0, %v1622_v51 }
 0x741   :  { %v1624_v53 = vsub.f32 2.0, %v1623_v52 }
 0x743   :  { %v1626_v54 = vsel %vm1625_vm3, %v1624_v53, 0.0 }
 0x744   :  { %1627 = vadd.xlane.f32.xlu0 %v1626_v54 }
 0x7d1   :  { %v1628_v55 = vpop.xlane.xlu0 %1627 }
 0x7d2   :  { %v1629_v26 = vrot.slane %v1628_v55, 4 }
 0x7d4   :  { %v1630_v48 = vadd.f32 %v1629_v26, %v1628_v55 }
 0x7d6   :  { %v1631_v56 = vrot.slane %v1630_v48, 2 }
 0x7d8   :  { %v1632_v57 = vadd.f32 %v1631_v56, %v1630_v48 }
 0x7da   :  { %v1633_v58 = vrot.slane %v1632_v57, 1 }
 0x7dc   :  { %v1634_v60 = vadd.f32 %v1633_v58, %v1632_v57 }
 0x7de   :  { %2065 = vpush %v1634_v60 }
 0x80f   :  { %s2066_s3 = spop %2065 }
 0x810   :  { %s1638_s13 = smul.f32 0.5, %s2066_s3 }
 0x812   :  { %s1639_s19 = smul.f32 2.0, %s1638_s13 }
 0x814   :  { %v1640_v61 = vstv %s1639_s19 }
 0x815   :  { %1641 = vst [vmem:[#allocation2] sm:$0x1] %v1640_v61 }
 0x816   :  { %2248 = shalt.err (!%p2245_p4)
}
 0x817   :  { %s2249_s1 = scalar_lea.hbm %s3027_s5, 16 }
 0x818   :  { %p2250_p5 = scmp.ne.s32.totalorder %s3027_s5, %s2249_s1  ;;  %p2253_p6 = scmp.lt.u32.totalorder %s2249_s1, %s3027_s5 }
 0x81a   :  { %p2255_p7 = pnand %p2253_p6, %p2250_p5 }
 0x81c   :  { %2258 = shalt.err (!%p2255_p7)
}
 0x81d   :  { %1651 = dma.vmem_to_hbm [thread:$0]  %s1649_s18, 16, %s3027_s5, [#allocation3]  }
 0x81e   :  { %2259 = dma.done.wait [#allocation3], 16  }
 0x81f   :  { %2260 = vsyncadd [#allocation3], 4294967280 }
 0x820   :  { %1655 = vsyncpa [#allocation3], 1 }

</bundles_post_ra>
